<compile_context>
chip_gen: v7x
topology: tpu7x:2x2x1
jax: 0.10.0
libtpu: 0.0.40
codegen_flags: <defaults>
</compile_context>

<pallas_src>
import functools

import jax
import jax.numpy as jnp
from jax.experimental import pallas as pl
from jax.experimental.pallas import tpu as pltpu


# ------------------------------ helpers ------------------------------------

def _full_spec(shape):
    """Full-array block for a single-step grid."""
    nd = len(shape)
    return pl.BlockSpec(shape, lambda i, _nd=nd: (0,) * _nd)


def _layernorm(z, g, b, eps=1e-5):
    mean = jnp.mean(z, axis=-1, keepdims=True)
    var = jnp.mean((z - mean) ** 2, axis=-1, keepdims=True)
    return (z - mean) * jax.lax.rsqrt(var + eps) * g + b


def _bf16(x):
    return x.astype(jnp.bfloat16)


# --------------------- fused encoder block (one kernel) ---------------------

def _encoder_block_kernel(valid_lens_ref,            # scalar-prefetch (SMEM)
                          x_ref, wqkv_ref, bqkv_ref, wo_ref, bo_ref,
                          g1_ref, b1_ref, w1_ref, fb1_ref, w2_ref, fb2_ref,
                          g2_ref, b2_ref, o_ref, *, num_heads):
    b = pl.program_id(0)
    vl = valid_lens_ref[b]                            # valid length for this batch row

    x = x_ref[0]                                      # (S, D) f32
    S, D = x.shape
    H = num_heads
    Dh = D // H
    scale = 1.0 / float(Dh) ** 0.5

    # Fused QKV projection: one MXU pass, bf16 operands, f32 accumulation.
    qkv = jnp.dot(_bf16(x), wqkv_ref[...],
                  preferred_element_type=jnp.float32) + bqkv_ref[...]   # (S, 3D)

    # Key-position mask built from the scalar valid length (d2l masked_softmax).
    key_pos = jax.lax.broadcasted_iota(jnp.int32, (S, S), 1)

    # Per-head attention, fully VMEM resident (static unrolled loop, H=4).
    ctx_heads = []
    for h in range(H):
        q_h = qkv[:, h * Dh:(h + 1) * Dh]
        k_h = qkv[:, D + h * Dh:D + (h + 1) * Dh]
        v_h = qkv[:, 2 * D + h * Dh:2 * D + (h + 1) * Dh]
        s = jax.lax.dot_general(
            _bf16(q_h), _bf16(k_h), (((1,), (1,)), ((), ())),
            preferred_element_type=jnp.float32) * scale                 # (S, S) f32
        s = jnp.where(key_pos < vl, s, -1e6)
        s = s - jnp.max(s, axis=-1, keepdims=True)
        p = jnp.exp(s)
        p = p * pl.reciprocal(jnp.sum(p, axis=-1, keepdims=True), approx=True)
        ctx_heads.append(jnp.dot(_bf16(p), _bf16(v_h),
                                 preferred_element_type=jnp.float32))   # (S, Dh)
    ctx = jnp.concatenate(ctx_heads, axis=-1)                           # (S, D)

    attn = jnp.dot(_bf16(ctx), wo_ref[...],
                   preferred_element_type=jnp.float32) + bo_ref[...]

    # Add & LayerNorm 1
    y1 = _layernorm(x + attn, g1_ref[...], b1_ref[...])

    # FFN (Linear -> ReLU -> Linear), fused
    hidden = jnp.dot(_bf16(y1), w1_ref[...],
                     preferred_element_type=jnp.float32) + fb1_ref[...]
    hidden = jnp.maximum(hidden, 0.0)
    ffn = jnp.dot(_bf16(hidden), w2_ref[...],
                  preferred_element_type=jnp.float32) + fb2_ref[...]

    # Add & LayerNorm 2
    o_ref[0] = _layernorm(y1 + ffn, g2_ref[...], b2_ref[...])


def encoder_block(X, valid_lens, p, num_heads):
    B, S, D = X.shape
    F = p["W1"].shape[1]

    grid_spec = pltpu.PrefetchScalarGridSpec(
        num_scalar_prefetch=1,                       # valid_lens -> SMEM
        grid=(B,),
        in_specs=[
            pl.BlockSpec((1, S, D), lambda b, vl: (b, 0, 0)),
            pl.BlockSpec((D, 3 * D), lambda b, vl: (0, 0)),
            pl.BlockSpec((1, 3 * D), lambda b, vl: (0, 0)),
            pl.BlockSpec((D, D), lambda b, vl: (0, 0)),
            pl.BlockSpec((1, D), lambda b, vl: (0, 0)),
            pl.BlockSpec((1, D), lambda b, vl: (0, 0)),
            pl.BlockSpec((1, D), lambda b, vl: (0, 0)),
            pl.BlockSpec((D, F), lambda b, vl: (0, 0)),
            pl.BlockSpec((1, F), lambda b, vl: (0, 0)),
            pl.BlockSpec((F, D), lambda b, vl: (0, 0)),
            pl.BlockSpec((1, D), lambda b, vl: (0, 0)),
            pl.BlockSpec((1, D), lambda b, vl: (0, 0)),
            pl.BlockSpec((1, D), lambda b, vl: (0, 0)),
        ],
        out_specs=pl.BlockSpec((1, S, D), lambda b, vl: (b, 0, 0)),
    )
    return pl.pallas_call(
        functools.partial(_encoder_block_kernel, num_heads=num_heads),
        grid_spec=grid_spec,
        out_shape=jax.ShapeDtypeStruct((B, S, D), jnp.float32),
        compiler_params=pltpu.CompilerParams(
            dimension_semantics=("parallel",)),      # batch rows -> both TCs on v7x
    )(valid_lens, X,
      p["Wqkv"], p["bqkv"], p["Wo"], p["bo"], p["ln1_g"], p["ln1_b"],
      p["W1"], p["b1"], p["W2"], p["b2"], p["ln2_g"], p["ln2_b"])


# ------------------------- fused MaskLM head kernel -------------------------

def _mlm_kernel(x_ref, w1_ref, b1_ref, g_ref, be_ref, w2_ref, b2_ref, o_ref):
    h = jnp.dot(_bf16(x_ref[...]), w1_ref[...],
                preferred_element_type=jnp.float32) + b1_ref[...]
    h = jnp.maximum(h, 0.0)
    h = _layernorm(h, g_ref[...], be_ref[...])
    o_ref[...] = jnp.dot(_bf16(h), w2_ref[...],
                         preferred_element_type=jnp.float32) + b2_ref[...]


def mlm_head(masked_X, params):
    M, D = masked_X.shape
    V = params["mlm_W2"].shape[1]
    return pl.pallas_call(
        _mlm_kernel,
        grid=(1,),
        out_shape=jax.ShapeDtypeStruct((M, V), jnp.float32),
        in_specs=[_full_spec((M, D)), _full_spec((D, D)), _full_spec((1, D)),
                  _full_spec((1, D)), _full_spec((1, D)),
                  _full_spec((D, V)), _full_spec((1, V))],
        out_specs=_full_spec((M, V)),
        compiler_params=pltpu.CompilerParams(dimension_semantics=("arbitrary",)),
    )(masked_X, params["mlm_W1"], params["mlm_b1"],
      params["mlm_ln_g"], params["mlm_ln_b"],
      params["mlm_W2"], params["mlm_b2"])


# --------------------- fused hidden+NSP head kernel --------------------------

def _nsp_kernel(x_ref, wh_ref, bh_ref, wn_ref, bn_ref, o_ref):
    h = jnp.tanh(jnp.dot(_bf16(x_ref[...]), wh_ref[...],
                         preferred_element_type=jnp.float32) + bh_ref[...])
    o_ref[...] = jnp.dot(_bf16(h), wn_ref[...],
                         preferred_element_type=jnp.float32) + bn_ref[...]


def nsp_head(cls, params):
    B, D = cls.shape
    return pl.pallas_call(
        _nsp_kernel,
        grid=(1,),
        out_shape=jax.ShapeDtypeStruct((B, 2), jnp.float32),
        in_specs=[_full_spec((B, D)), _full_spec((D, D)), _full_spec((1, D)),
                  _full_spec((D, 2)), _full_spec((1, 2))],
        out_specs=_full_spec((B, 2)),
        compiler_params=pltpu.CompilerParams(dimension_semantics=("arbitrary",)),
    )(cls, params["hid_W"], params["hid_b"], params["nsp_W"], params["nsp_b"])


# ------------------------------- model glue ---------------------------------

def bert_forward(params, tokens, segments, valid_lens, pred_positions, num_heads):
    B, S = tokens.shape
    # Embedding lookups are data-dependent gathers -> plain JAX glue.
    X = params["tok_emb"][tokens] + params["seg_emb"][segments]
    X = X + params["pos_emb"][:, :S, :]

    for lp in params["layers"]:
        X = encoder_block(X, valid_lens, lp, num_heads)
    encoded_X = X

    # MaskLM head (fused kernel). Gather of masked positions stays in JAX.
    # TODO(synk): fuse this gather into the MLM kernel via scalar-prefetched
    #             pred_positions + a pl.Element row index_map at real sizes.
    num_pred = pred_positions.shape[1]
    batch_idx = jnp.repeat(jnp.arange(B), num_pred)
    masked_X = encoded_X[batch_idx, pred_positions.reshape(-1)]      # (B*P, D)
    mlm_Y_hat = mlm_head(masked_X, params).reshape(B, num_pred, -1)

    # hidden (Linear+Tanh) on [CLS] fused with NextSentencePred.
    cls = encoded_X[:, 0, :]
    nsp_Y_hat = nsp_head(cls, params)

    return encoded_X, mlm_Y_hat, nsp_Y_hat


def init_params(key, vocab_size, num_hiddens, ffn_num_hiddens, num_layers,
                max_len, num_heads):
    keys = iter(jax.random.split(key, 8 * num_layers + 16))

    def nrm(shape, std=0.02, dtype=jnp.float32):
        return (std * jax.random.normal(next(keys), shape)).astype(dtype)

    def dense(din, dout):
        # MXU operands stored bf16 (halves weight DMA bytes); bias kept f32.
        return nrm((din, dout), dtype=jnp.bfloat16), jnp.zeros((1, dout), jnp.float32)

    D, F = num_hiddens, ffn_num_hiddens
    p = {
        "tok_emb": nrm((vocab_size, D)),
        "seg_emb": nrm((2, D)),
        "pos_emb": nrm((1, max_len, D)),
        "layers": [],
    }
    for _ in range(num_layers):
        lp = {}
        lp["Wqkv"], lp["bqkv"] = dense(D, 3 * D)     # fused Wq|Wk|Wv
        lp["Wo"], lp["bo"] = dense(D, D)
        lp["ln1_g"] = jnp.ones((1, D), jnp.float32)
        lp["ln1_b"] = jnp.zeros((1, D), jnp.float32)
        lp["W1"], lp["b1"] = dense(D, F)
        lp["W2"], lp["b2"] = dense(F, D)
        lp["ln2_g"] = jnp.ones((1, D), jnp.float32)
        lp["ln2_b"] = jnp.zeros((1, D), jnp.float32)
        p["layers"].append(lp)

    p["mlm_W1"], p["mlm_b1"] = dense(D, D)
    p["mlm_ln_g"] = jnp.ones((1, D), jnp.float32)
    p["mlm_ln_b"] = jnp.zeros((1, D), jnp.float32)
    p["mlm_W2"], p["mlm_b2"] = dense(D, vocab_size)
    p["hid_W"], p["hid_b"] = dense(D, D)
    p["nsp_W"], p["nsp_b"] = dense(D, 2)
    return p


if __name__ == "__main__":
    vocab_size = 128          # lane-dense MLM output
    num_hiddens = 32
    ffn_num_hiddens = 64
    num_heads = 4
    num_layers = 2
    max_len = 64

    key = jax.random.PRNGKey(0)
    pkey, tkey = jax.random.split(key)

    params = init_params(pkey, vocab_size, num_hiddens, ffn_num_hiddens,
                         num_layers, max_len, num_heads)

    tokens = jax.random.randint(tkey, (2, 8), 0, vocab_size, dtype=jnp.int32)
    segments = jnp.array([[0, 0, 0, 0, 1, 1, 1, 1],
                          [0, 0, 0, 1, 1, 1, 1, 1]], dtype=jnp.int32)
    valid_lens = jnp.array([8, 6], dtype=jnp.int32)
    pred_positions = jnp.array([[1, 5, 2], [6, 1, 5]], dtype=jnp.int32)

    fwd = jax.jit(functools.partial(bert_forward, num_heads=num_heads))
    encoded_X, mlm_Y_hat, nsp_Y_hat = fwd(params, tokens, segments,
                                          valid_lens, pred_positions)
    jax.block_until_ready((encoded_X, mlm_Y_hat, nsp_Y_hat))

    assert encoded_X.shape == (2, 8, num_hiddens)
    assert mlm_Y_hat.shape == (2, 3, vocab_size)
    assert nsp_Y_hat.shape == (2, 2)
    assert bool(jnp.all(jnp.isfinite(encoded_X)))
    assert bool(jnp.all(jnp.isfinite(mlm_Y_hat)))
    assert bool(jnp.all(jnp.isfinite(nsp_Y_hat)))
    print("KERNEL_OK")
</pallas_src>

<mosaic_0001>
module attributes {stable_mosaic.version = 11 : i64} {
  func.func @_mlm_kernel(%arg0: i32, %arg1: memref<6x32xf32, #tpu.memory_space<vmem>>, %arg2: memref<32x32xbf16, #tpu.memory_space<vmem>>, %arg3: memref<1x32xf32, #tpu.memory_space<vmem>>, %arg4: memref<1x32xf32, #tpu.memory_space<vmem>>, %arg5: memref<1x32xf32, #tpu.memory_space<vmem>>, %arg6: memref<32x128xbf16, #tpu.memory_space<vmem>>, %arg7: memref<1x128xf32, #tpu.memory_space<vmem>>, %arg8: memref<6x128xf32, #tpu.memory_space<vmem>>) attributes {dimension_semantics = [#tpu.dimension_semantics<arbitrary>], iteration_bounds = array<i64: 1>, scalar_prefetch = 0 : i64, scratch_operands = 0 : i64, tpu.core_type = #tpu.core_type<tc>, window_params = [{pipeline_mode = #tpu.pipeline_mode<synchronous>, transform_indices = @transform_0, window_bounds = array<i64: 6, 32>}, {pipeline_mode = #tpu.pipeline_mode<synchronous>, transform_indices = @transform_1, window_bounds = array<i64: 32, 32>}, {pipeline_mode = #tpu.pipeline_mode<synchronous>, transform_indices = @transform_2, window_bounds = array<i64: 1, 32>}, {pipeline_mode = #tpu.pipeline_mode<synchronous>, transform_indices = @transform_3, window_bounds = array<i64: 1, 32>}, {pipeline_mode = #tpu.pipeline_mode<synchronous>, transform_indices = @transform_4, window_bounds = array<i64: 1, 32>}, {pipeline_mode = #tpu.pipeline_mode<synchronous>, transform_indices = @transform_5, window_bounds = array<i64: 32, 128>}, {pipeline_mode = #tpu.pipeline_mode<synchronous>, transform_indices = @transform_6, window_bounds = array<i64: 1, 128>}, {pipeline_mode = #tpu.pipeline_mode<synchronous>, transform_indices = @transform_7, window_bounds = array<i64: 6, 128>}]} {
    %c0 = arith.constant 0 : index
    %c0_0 = arith.constant 0 : index
    %0 = vector.load %arg1[%c0, %c0_0] : memref<6x32xf32, #tpu.memory_space<vmem>>, vector<6x32xf32>
    %1 = arith.truncf %0 : vector<6x32xf32> to vector<6x32xbf16>
    %c0_1 = arith.constant 0 : index
    %c0_2 = arith.constant 0 : index
    %2 = vector.load %arg2[%c0_1, %c0_2] : memref<32x32xbf16, #tpu.memory_space<vmem>>, vector<32x32xbf16>
    %cst = arith.constant dense<0.000000e+00> : vector<6x32xf32>
    %3 = tpu.matmul %1, %2, %cst {dimension_numbers = #tpu.dot_dimension_numbers<[1], [0], [0], [1], [0, 0, 1, 1], [], []>} : vector<6x32xbf16>, vector<32x32xbf16>, vector<6x32xf32> -> vector<6x32xf32>
    %c0_3 = arith.constant 0 : index
    %c0_4 = arith.constant 0 : index
    %4 = vector.load %arg3[%c0_3, %c0_4] : memref<1x32xf32, #tpu.memory_space<vmem>>, vector<1x32xf32>
    %5 = vector.broadcast %4 : vector<1x32xf32> to vector<6x32xf32>
    %6 = arith.addf %3, %5 : vector<6x32xf32>
    %cst_5 = arith.constant 0.000000e+00 : f32
    %7 = vector.broadcast %cst_5 : f32 to vector<6x32xf32>
    %8 = arith.maximumf %6, %7 : vector<6x32xf32>
    %c0_6 = arith.constant 0 : index
    %c0_7 = arith.constant 0 : index
    %9 = vector.load %arg4[%c0_6, %c0_7] : memref<1x32xf32, #tpu.memory_space<vmem>>, vector<1x32xf32>
    %c0_8 = arith.constant 0 : index
    %c0_9 = arith.constant 0 : index
    %10 = vector.load %arg5[%c0_8, %c0_9] : memref<1x32xf32, #tpu.memory_space<vmem>>, vector<1x32xf32>
    %cst_10 = arith.constant dense<0.000000e+00> : vector<6xf32>
    %11 = vector.multi_reduction <add>, %8, %cst_10 [1] : vector<6x32xf32> to vector<6xf32>
    %12 = vector.shape_cast %11 : vector<6xf32> to vector<6x1xf32>
    %cst_11 = arith.constant 3.200000e+01 : f32
    %13 = vector.broadcast %cst_11 : f32 to vector<6x1xf32>
    %14 = arith.divf %12, %13 : vector<6x1xf32>
    %15 = vector.broadcast %14 : vector<6x1xf32> to vector<6x32xf32>
    %16 = arith.subf %8, %15 : vector<6x32xf32>
    %17 = arith.mulf %16, %16 : vector<6x32xf32>
    %cst_12 = arith.constant dense<0.000000e+00> : vector<6xf32>
    %18 = vector.multi_reduction <add>, %17, %cst_12 [1] : vector<6x32xf32> to vector<6xf32>
    %19 = vector.shape_cast %18 : vector<6xf32> to vector<6x1xf32>
    %cst_13 = arith.constant 3.200000e+01 : f32
    %20 = vector.broadcast %cst_13 : f32 to vector<6x1xf32>
    %21 = arith.divf %19, %20 : vector<6x1xf32>
    %22 = vector.broadcast %14 : vector<6x1xf32> to vector<6x32xf32>
    %23 = arith.subf %8, %22 : vector<6x32xf32>
    %cst_14 = arith.constant 9.99999974E-6 : f32
    %24 = vector.broadcast %cst_14 : f32 to vector<6x1xf32>
    %25 = arith.addf %21, %24 : vector<6x1xf32>
    %26 = math.rsqrt %25 : vector<6x1xf32>
    %27 = vector.broadcast %26 : vector<6x1xf32> to vector<6x32xf32>
    %28 = arith.mulf %23, %27 : vector<6x32xf32>
    %29 = vector.broadcast %9 : vector<1x32xf32> to vector<6x32xf32>
    %30 = arith.mulf %28, %29 : vector<6x32xf32>
    %31 = vector.broadcast %10 : vector<1x32xf32> to vector<6x32xf32>
    %32 = arith.addf %30, %31 : vector<6x32xf32>
    %33 = arith.truncf %32 : vector<6x32xf32> to vector<6x32xbf16>
    %c0_15 = arith.constant 0 : index
    %c0_16 = arith.constant 0 : index
    %34 = vector.load %arg6[%c0_15, %c0_16] : memref<32x128xbf16, #tpu.memory_space<vmem>>, vector<32x128xbf16>
    %cst_17 = arith.constant dense<0.000000e+00> : vector<6x128xf32>
    %35 = tpu.matmul %33, %34, %cst_17 {dimension_numbers = #tpu.dot_dimension_numbers<[1], [0], [0], [1], [0, 0, 1, 1], [], []>} : vector<6x32xbf16>, vector<32x128xbf16>, vector<6x128xf32> -> vector<6x128xf32>
    %c0_18 = arith.constant 0 : index
    %c0_19 = arith.constant 0 : index
    %36 = vector.load %arg7[%c0_18, %c0_19] : memref<1x128xf32, #tpu.memory_space<vmem>>, vector<1x128xf32>
    %37 = vector.broadcast %36 : vector<1x128xf32> to vector<6x128xf32>
    %38 = arith.addf %35, %37 : vector<6x128xf32>
    %c0_20 = arith.constant 0 : index
    %c0_21 = arith.constant 0 : index
    %39 = vector.load %arg8[%c0_20, %c0_21] : memref<6x128xf32, #tpu.memory_space<vmem>>, vector<6x128xf32>
    tpu.vector_store %arg8[%c0_20, %c0_21], %38 {strides = array<i32>} : memref<6x128xf32, #tpu.memory_space<vmem>>, vector<6x128xf32>,
    return
  }
  func.func @transform_0(%arg0: i32) -> (i32, i32) {
    %c0_i32 = arith.constant 0 : i32
    %c0_i32_0 = arith.constant 0 : i32
    %c0_i32_1 = arith.constant 0 : i32
    return %c0_i32, %c0_i32_0 : i32, i32
  }
  func.func @transform_1(%arg0: i32) -> (i32, i32) {
    %c0_i32 = arith.constant 0 : i32
    %c0_i32_0 = arith.constant 0 : i32
    %c0_i32_1 = arith.constant 0 : i32
    return %c0_i32, %c0_i32_0 : i32, i32
  }
  func.func @transform_2(%arg0: i32) -> (i32, i32) {
    %c0_i32 = arith.constant 0 : i32
    %c0_i32_0 = arith.constant 0 : i32
    %c0_i32_1 = arith.constant 0 : i32
    return %c0_i32, %c0_i32_0 : i32, i32
  }
  func.func @transform_3(%arg0: i32) -> (i32, i32) {
    %c0_i32 = arith.constant 0 : i32
    %c0_i32_0 = arith.constant 0 : i32
    %c0_i32_1 = arith.constant 0 : i32
    return %c0_i32, %c0_i32_0 : i32, i32
  }
  func.func @transform_4(%arg0: i32) -> (i32, i32) {
    %c0_i32 = arith.constant 0 : i32
    %c0_i32_0 = arith.constant 0 : i32
    %c0_i32_1 = arith.constant 0 : i32
    return %c0_i32, %c0_i32_0 : i32, i32
  }
  func.func @transform_5(%arg0: i32) -> (i32, i32) {
    %c0_i32 = arith.constant 0 : i32
    %c0_i32_0 = arith.constant 0 : i32
    %c0_i32_1 = arith.constant 0 : i32
    return %c0_i32, %c0_i32_0 : i32, i32
  }
  func.func @transform_6(%arg0: i32) -> (i32, i32) {
    %c0_i32 = arith.constant 0 : i32
    %c0_i32_0 = arith.constant 0 : i32
    %c0_i32_1 = arith.constant 0 : i32
    return %c0_i32, %c0_i32_0 : i32, i32
  }
  func.func @transform_7(%arg0: i32) -> (i32, i32) {
    %c0_i32 = arith.constant 0 : i32
    %c0_i32_0 = arith.constant 0 : i32
    %c0_i32_1 = arith.constant 0 : i32
    return %c0_i32, %c0_i32_0 : i32, i32
  }
}

module attributes {stable_mosaic.version = 11 : i64} {
  func.func @_encoder_block_kernel(%arg0: i32, %arg1: memref<2xi32, #tpu.memory_space<smem>>, %arg2: memref<1x8x32xf32, #tpu.memory_space<vmem>>, %arg3: memref<32x96xbf16, #tpu.memory_space<vmem>>, %arg4: memref<1x96xf32, #tpu.memory_space<vmem>>, %arg5: memref<32x32xbf16, #tpu.memory_space<vmem>>, %arg6: memref<1x32xf32, #tpu.memory_space<vmem>>, %arg7: memref<1x32xf32, #tpu.memory_space<vmem>>, %arg8: memref<1x32xf32, #tpu.memory_space<vmem>>, %arg9: memref<32x64xbf16, #tpu.memory_space<vmem>>, %arg10: memref<1x64xf32, #tpu.memory_space<vmem>>, %arg11: memref<64x32xbf16, #tpu.memory_space<vmem>>, %arg12: memref<1x32xf32, #tpu.memory_space<vmem>>, %arg13: memref<1x32xf32, #tpu.memory_space<vmem>>, %arg14: memref<1x32xf32, #tpu.memory_space<vmem>>, %arg15: memref<1x8x32xf32, #tpu.memory_space<vmem>>) attributes {dimension_semantics = [#tpu.dimension_semantics<parallel>], iteration_bounds = array<i64: 2>, scalar_prefetch = 1 : i64, scratch_operands = 0 : i64, tpu.core_type = #tpu.core_type<tc>, window_params = [{transform_indices = @transform_0, window_bounds = array<i64: 1, 8, 32>}, {pipeline_mode = #tpu.pipeline_mode<synchronous>, transform_indices = @transform_1, window_bounds = array<i64: 32, 96>}, {pipeline_mode = #tpu.pipeline_mode<synchronous>, transform_indices = @transform_2, window_bounds = array<i64: 1, 96>}, {pipeline_mode = #tpu.pipeline_mode<synchronous>, transform_indices = @transform_3, window_bounds = array<i64: 32, 32>}, {pipeline_mode = #tpu.pipeline_mode<synchronous>, transform_indices = @transform_4, window_bounds = array<i64: 1, 32>}, {pipeline_mode = #tpu.pipeline_mode<synchronous>, transform_indices = @transform_5, window_bounds = array<i64: 1, 32>}, {pipeline_mode = #tpu.pipeline_mode<synchronous>, transform_indices = @transform_6, window_bounds = array<i64: 1, 32>}, {pipeline_mode = #tpu.pipeline_mode<synchronous>, transform_indices = @transform_7, window_bounds = array<i64: 32, 64>}, {pipeline_mode = #tpu.pipeline_mode<synchronous>, transform_indices = @transform_8, window_bounds = array<i64: 1, 64>}, {pipeline_mode = #tpu.pipeline_mode<synchronous>, transform_indices = @transform_9, window_bounds = array<i64: 64, 32>}, {pipeline_mode = #tpu.pipeline_mode<synchronous>, transform_indices = @transform_10, window_bounds = array<i64: 1, 32>}, {pipeline_mode = #tpu.pipeline_mode<synchronous>, transform_indices = @transform_11, window_bounds = array<i64: 1, 32>}, {pipeline_mode = #tpu.pipeline_mode<synchronous>, transform_indices = @transform_12, window_bounds = array<i64: 1, 32>}, {transform_indices = @transform_13, window_bounds = array<i64: 1, 8, 32>}]} {
    %0 = arith.index_cast %arg0 : i32 to index
    %1 = memref.load %arg1[%0] : memref<2xi32, #tpu.memory_space<smem>>
    %c0 = arith.constant 0 : index
    %c0_0 = arith.constant 0 : index
    %c0_1 = arith.constant 0 : index
    %2 = vector.load %arg2[%c0, %c0_0, %c0_1] : memref<1x8x32xf32, #tpu.memory_space<vmem>>, vector<1x8x32xf32>
    %3 = vector.shape_cast %2 : vector<1x8x32xf32> to vector<8x32xf32>
    %4 = arith.truncf %3 : vector<8x32xf32> to vector<8x32xbf16>
    %c0_2 = arith.constant 0 : index
    %c0_3 = arith.constant 0 : index
    %5 = vector.load %arg3[%c0_2, %c0_3] : memref<32x96xbf16, #tpu.memory_space<vmem>>, vector<32x96xbf16>
    %cst = arith.constant dense<0.000000e+00> : vector<8x96xf32>
    %6 = tpu.matmul %4, %5, %cst {dimension_numbers = #tpu.dot_dimension_numbers<[1], [0], [0], [1], [0, 0, 1, 1], [], []>} : vector<8x32xbf16>, vector<32x96xbf16>, vector<8x96xf32> -> vector<8x96xf32>
    %c0_4 = arith.constant 0 : index
    %c0_5 = arith.constant 0 : index
    %7 = vector.load %arg4[%c0_4, %c0_5] : memref<1x96xf32, #tpu.memory_space<vmem>>, vector<1x96xf32>
    %8 = vector.broadcast %7 : vector<1x96xf32> to vector<8x96xf32>
    %9 = arith.addf %6, %8 : vector<8x96xf32>
    %10 = tpu.iota {dimensions = array<i32: 1>} : vector<8x8xi32>
    %11 = vector.extract_strided_slice %9 {offsets = [0, 0], sizes = [8, 8], strides = [1, 1]} : vector<8x96xf32> to vector<8x8xf32>
    %12 = vector.extract_strided_slice %9 {offsets = [0, 32], sizes = [8, 8], strides = [1, 1]} : vector<8x96xf32> to vector<8x8xf32>
    %13 = vector.extract_strided_slice %9 {offsets = [0, 64], sizes = [8, 8], strides = [1, 1]} : vector<8x96xf32> to vector<8x8xf32>
    %14 = arith.truncf %11 : vector<8x8xf32> to vector<8x8xbf16>
    %15 = arith.truncf %12 : vector<8x8xf32> to vector<8x8xbf16>
    %cst_6 = arith.constant dense<0.000000e+00> : vector<8x8xf32>
    %16 = tpu.matmul %14, %15, %cst_6 {dimension_numbers = #tpu.dot_dimension_numbers<[1], [1], [0], [0], [0, 0, 1, 0], [], []>} : vector<8x8xbf16>, vector<8x8xbf16>, vector<8x8xf32> -> vector<8x8xf32>
    %cst_7 = arith.constant 0.353553385 : f32
    %17 = vector.broadcast %cst_7 : f32 to vector<8x8xf32>
    %18 = arith.mulf %16, %17 : vector<8x8xf32>
    %19 = vector.broadcast %1 : i32 to vector<8x8xi32>
    %20 = arith.cmpi slt, %10, %19 : vector<8x8xi32>
    %cst_8 = arith.constant -1.000000e+06 : f32
    %21 = vector.broadcast %cst_8 : f32 to vector<8x8xf32>
    %22 = arith.select %20, %18, %21 : vector<8x8xi1>, vector<8x8xf32>
    %cst_9 = arith.constant dense<0xFF800000> : vector<8xf32>
    %23 = vector.multi_reduction <maximumf>, %22, %cst_9 [1] : vector<8x8xf32> to vector<8xf32>
    %24 = vector.shape_cast %23 : vector<8xf32> to vector<8x1xf32>
    %25 = vector.broadcast %24 : vector<8x1xf32> to vector<8x8xf32>
    %26 = arith.subf %22, %25 : vector<8x8xf32>
    %27 = math.exp %26 : vector<8x8xf32>
    %cst_10 = arith.constant dense<0.000000e+00> : vector<8xf32>
    %28 = vector.multi_reduction <add>, %27, %cst_10 [1] : vector<8x8xf32> to vector<8xf32>
    %29 = vector.shape_cast %28 : vector<8xf32> to vector<8x1xf32>
    %30 = tpu.reciprocal %29 {approx = true} : vector<8x1xf32> -> vector<8x1xf32>
    %31 = vector.broadcast %30 : vector<8x1xf32> to vector<8x8xf32>
    %32 = arith.mulf %27, %31 : vector<8x8xf32>
    %33 = arith.truncf %32 : vector<8x8xf32> to vector<8x8xbf16>
    %34 = arith.truncf %13 : vector<8x8xf32> to vector<8x8xbf16>
    %cst_11 = arith.constant dense<0.000000e+00> : vector<8x8xf32>
    %35 = tpu.matmul %33, %34, %cst_11 {dimension_numbers = #tpu.dot_dimension_numbers<[1], [0], [0], [1], [0, 0, 1, 1], [], []>} : vector<8x8xbf16>, vector<8x8xbf16>, vector<8x8xf32> -> vector<8x8xf32>
    %36 = vector.extract_strided_slice %9 {offsets = [0, 8], sizes = [8, 8], strides = [1, 1]} : vector<8x96xf32> to vector<8x8xf32>
    %37 = vector.extract_strided_slice %9 {offsets = [0, 40], sizes = [8, 8], strides = [1, 1]} : vector<8x96xf32> to vector<8x8xf32>
    %38 = vector.extract_strided_slice %9 {offsets = [0, 72], sizes = [8, 8], strides = [1, 1]} : vector<8x96xf32> to vector<8x8xf32>
    %39 = arith.truncf %36 : vector<8x8xf32> to vector<8x8xbf16>
    %40 = arith.truncf %37 : vector<8x8xf32> to vector<8x8xbf16>
    %cst_12 = arith.constant dense<0.000000e+00> : vector<8x8xf32>
    %41 = tpu.matmul %39, %40, %cst_12 {dimension_numbers = #tpu.dot_dimension_numbers<[1], [1], [0], [0], [0, 0, 1, 0], [], []>} : vector<8x8xbf16>, vector<8x8xbf16>, vector<8x8xf32> -> vector<8x8xf32>
    %cst_13 = arith.constant 0.353553385 : f32
    %42 = vector.broadcast %cst_13 : f32 to vector<8x8xf32>
    %43 = arith.mulf %41, %42 : vector<8x8xf32>
    %44 = vector.broadcast %1 : i32 to vector<8x8xi32>
    %45 = arith.cmpi slt, %10, %44 : vector<8x8xi32>
    %cst_14 = arith.constant -1.000000e+06 : f32
    %46 = vector.broadcast %cst_14 : f32 to vector<8x8xf32>
    %47 = arith.select %45, %43, %46 : vector<8x8xi1>, vector<8x8xf32>
    %cst_15 = arith.constant dense<0xFF800000> : vector<8xf32>
    %48 = vector.multi_reduction <maximumf>, %47, %cst_15 [1] : vector<8x8xf32> to vector<8xf32>
    %49 = vector.shape_cast %48 : vector<8xf32> to vector<8x1xf32>
    %50 = vector.broadcast %49 : vector<8x1xf32> to vector<8x8xf32>
    %51 = arith.subf %47, %50 : vector<8x8xf32>
    %52 = math.exp %51 : vector<8x8xf32>
    %cst_16 = arith.constant dense<0.000000e+00> : vector<8xf32>
    %53 = vector.multi_reduction <add>, %52, %cst_16 [1] : vector<8x8xf32> to vector<8xf32>
    %54 = vector.shape_cast %53 : vector<8xf32> to vector<8x1xf32>
    %55 = tpu.reciprocal %54 {approx = true} : vector<8x1xf32> -> vector<8x1xf32>
    %56 = vector.broadcast %55 : vector<8x1xf32> to vector<8x8xf32>
    %57 = arith.mulf %52, %56 : vector<8x8xf32>
    %58 = arith.truncf %57 : vector<8x8xf32> to vector<8x8xbf16>
    %59 = arith.truncf %38 : vector<8x8xf32> to vector<8x8xbf16>
    %cst_17 = arith.constant dense<0.000000e+00> : vector<8x8xf32>
    %60 = tpu.matmul %58, %59, %cst_17 {dimension_numbers = #tpu.dot_dimension_numbers<[1], [0], [0], [1], [0, 0, 1, 1], [], []>} : vector<8x8xbf16>, vector<8x8xbf16>, vector<8x8xf32> -> vector<8x8xf32>
    %61 = vector.extract_strided_slice %9 {offsets = [0, 16], sizes = [8, 8], strides = [1, 1]} : vector<8x96xf32> to vector<8x8xf32>
    %62 = vector.extract_strided_slice %9 {offsets = [0, 48], sizes = [8, 8], strides = [1, 1]} : vector<8x96xf32> to vector<8x8xf32>
    %63 = vector.extract_strided_slice %9 {offsets = [0, 80], sizes = [8, 8], strides = [1, 1]} : vector<8x96xf32> to vector<8x8xf32>
    %64 = arith.truncf %61 : vector<8x8xf32> to vector<8x8xbf16>
    %65 = arith.truncf %62 : vector<8x8xf32> to vector<8x8xbf16>
    %cst_18 = arith.constant dense<0.000000e+00> : vector<8x8xf32>
    %66 = tpu.matmul %64, %65, %cst_18 {dimension_numbers = #tpu.dot_dimension_numbers<[1], [1], [0], [0], [0, 0, 1, 0], [], []>} : vector<8x8xbf16>, vector<8x8xbf16>, vector<8x8xf32> -> vector<8x8xf32>
    %cst_19 = arith.constant 0.353553385 : f32
    %67 = vector.broadcast %cst_19 : f32 to vector<8x8xf32>
    %68 = arith.mulf %66, %67 : vector<8x8xf32>
    %69 = vector.broadcast %1 : i32 to vector<8x8xi32>
    %70 = arith.cmpi slt, %10, %69 : vector<8x8xi32>
    %cst_20 = arith.constant -1.000000e+06 : f32
    %71 = vector.broadcast %cst_20 : f32 to vector<8x8xf32>
    %72 = arith.select %70, %68, %71 : vector<8x8xi1>, vector<8x8xf32>
    %cst_21 = arith.constant dense<0xFF800000> : vector<8xf32>
    %73 = vector.multi_reduction <maximumf>, %72, %cst_21 [1] : vector<8x8xf32> to vector<8xf32>
    %74 = vector.shape_cast %73 : vector<8xf32> to vector<8x1xf32>
    %75 = vector.broadcast %74 : vector<8x1xf32> to vector<8x8xf32>
    %76 = arith.subf %72, %75 : vector<8x8xf32>
    %77 = math.exp %76 : vector<8x8xf32>
    %cst_22 = arith.constant dense<0.000000e+00> : vector<8xf32>
    %78 = vector.multi_reduction <add>, %77, %cst_22 [1] : vector<8x8xf32> to vector<8xf32>
    %79 = vector.shape_cast %78 : vector<8xf32> to vector<8x1xf32>
    %80 = tpu.reciprocal %79 {approx = true} : vector<8x1xf32> -> vector<8x1xf32>
    %81 = vector.broadcast %80 : vector<8x1xf32> to vector<8x8xf32>
    %82 = arith.mulf %77, %81 : vector<8x8xf32>
    %83 = arith.truncf %82 : vector<8x8xf32> to vector<8x8xbf16>
    %84 = arith.truncf %63 : vector<8x8xf32> to vector<8x8xbf16>
    %cst_23 = arith.constant dense<0.000000e+00> : vector<8x8xf32>
    %85 = tpu.matmul %83, %84, %cst_23 {dimension_numbers = #tpu.dot_dimension_numbers<[1], [0], [0], [1], [0, 0, 1, 1], [], []>} : vector<8x8xbf16>, vector<8x8xbf16>, vector<8x8xf32> -> vector<8x8xf32>
    %86 = vector.extract_strided_slice %9 {offsets = [0, 24], sizes = [8, 8], strides = [1, 1]} : vector<8x96xf32> to vector<8x8xf32>
    %87 = vector.extract_strided_slice %9 {offsets = [0, 56], sizes = [8, 8], strides = [1, 1]} : vector<8x96xf32> to vector<8x8xf32>
    %88 = vector.extract_strided_slice %9 {offsets = [0, 88], sizes = [8, 8], strides = [1, 1]} : vector<8x96xf32> to vector<8x8xf32>
    %89 = arith.truncf %86 : vector<8x8xf32> to vector<8x8xbf16>
    %90 = arith.truncf %87 : vector<8x8xf32> to vector<8x8xbf16>
    %cst_24 = arith.constant dense<0.000000e+00> : vector<8x8xf32>
    %91 = tpu.matmul %89, %90, %cst_24 {dimension_numbers = #tpu.dot_dimension_numbers<[1], [1], [0], [0], [0, 0, 1, 0], [], []>} : vector<8x8xbf16>, vector<8x8xbf16>, vector<8x8xf32> -> vector<8x8xf32>
    %cst_25 = arith.constant 0.353553385 : f32
    %92 = vector.broadcast %cst_25 : f32 to vector<8x8xf32>
    %93 = arith.mulf %91, %92 : vector<8x8xf32>
    %94 = vector.broadcast %1 : i32 to vector<8x8xi32>
    %95 = arith.cmpi slt, %10, %94 : vector<8x8xi32>
    %cst_26 = arith.constant -1.000000e+06 : f32
    %96 = vector.broadcast %cst_26 : f32 to vector<8x8xf32>
    %97 = arith.select %95, %93, %96 : vector<8x8xi1>, vector<8x8xf32>
    %cst_27 = arith.constant dense<0xFF800000> : vector<8xf32>
    %98 = vector.multi_reduction <maximumf>, %97, %cst_27 [1] : vector<8x8xf32> to vector<8xf32>
    %99 = vector.shape_cast %98 : vector<8xf32> to vector<8x1xf32>
    %100 = vector.broadcast %99 : vector<8x1xf32> to vector<8x8xf32>
    %101 = arith.subf %97, %100 : vector<8x8xf32>
    %102 = math.exp %101 : vector<8x8xf32>
    %cst_28 = arith.constant dense<0.000000e+00> : vector<8xf32>
    %103 = vector.multi_reduction <add>, %102, %cst_28 [1] : vector<8x8xf32> to vector<8xf32>
    %104 = vector.shape_cast %103 : vector<8xf32> to vector<8x1xf32>
    %105 = tpu.reciprocal %104 {approx = true} : vector<8x1xf32> -> vector<8x1xf32>
    %106 = vector.broadcast %105 : vector<8x1xf32> to vector<8x8xf32>
    %107 = arith.mulf %102, %106 : vector<8x8xf32>
    %108 = arith.truncf %107 : vector<8x8xf32> to vector<8x8xbf16>
    %109 = arith.truncf %88 : vector<8x8xf32> to vector<8x8xbf16>
    %cst_29 = arith.constant dense<0.000000e+00> : vector<8x8xf32>
    %110 = tpu.matmul %108, %109, %cst_29 {dimension_numbers = #tpu.dot_dimension_numbers<[1], [0], [0], [1], [0, 0, 1, 1], [], []>} : vector<8x8xbf16>, vector<8x8xbf16>, vector<8x8xf32> -> vector<8x8xf32>
    %111 = tpu.concatenate %35, %60, %85, %110 in 1 : vector<8x8xf32>, vector<8x8xf32>, vector<8x8xf32>, vector<8x8xf32> -> vector<8x32xf32>
    %112 = arith.truncf %111 : vector<8x32xf32> to vector<8x32xbf16>
    %c0_30 = arith.constant 0 : index
    %c0_31 = arith.constant 0 : index
    %113 = vector.load %arg5[%c0_30, %c0_31] : memref<32x32xbf16, #tpu.memory_space<vmem>>, vector<32x32xbf16>
    %cst_32 = arith.constant dense<0.000000e+00> : vector<8x32xf32>
    %114 = tpu.matmul %112, %113, %cst_32 {dimension_numbers = #tpu.dot_dimension_numbers<[1], [0], [0], [1], [0, 0, 1, 1], [], []>} : vector<8x32xbf16>, vector<32x32xbf16>, vector<8x32xf32> -> vector<8x32xf32>
    %c0_33 = arith.constant 0 : index
    %c0_34 = arith.constant 0 : index
    %115 = vector.load %arg6[%c0_33, %c0_34] : memref<1x32xf32, #tpu.memory_space<vmem>>, vector<1x32xf32>
    %116 = vector.broadcast %115 : vector<1x32xf32> to vector<8x32xf32>
    %117 = arith.addf %114, %116 : vector<8x32xf32>
    %118 = arith.addf %3, %117 : vector<8x32xf32>
    %c0_35 = arith.constant 0 : index
    %c0_36 = arith.constant 0 : index
    %119 = vector.load %arg7[%c0_35, %c0_36] : memref<1x32xf32, #tpu.memory_space<vmem>>, vector<1x32xf32>
    %c0_37 = arith.constant 0 : index
    %c0_38 = arith.constant 0 : index
    %120 = vector.load %arg8[%c0_37, %c0_38] : memref<1x32xf32, #tpu.memory_space<vmem>>, vector<1x32xf32>
    %cst_39 = arith.constant dense<0.000000e+00> : vector<8xf32>
    %121 = vector.multi_reduction <add>, %118, %cst_39 [1] : vector<8x32xf32> to vector<8xf32>
    %122 = vector.shape_cast %121 : vector<8xf32> to vector<8x1xf32>
    %cst_40 = arith.constant 3.200000e+01 : f32
    %123 = vector.broadcast %cst_40 : f32 to vector<8x1xf32>
    %124 = arith.divf %122, %123 : vector<8x1xf32>
    %125 = vector.broadcast %124 : vector<8x1xf32> to vector<8x32xf32>
    %126 = arith.subf %118, %125 : vector<8x32xf32>
    %127 = arith.mulf %126, %126 : vector<8x32xf32>
    %cst_41 = arith.constant dense<0.000000e+00> : vector<8xf32>
    %128 = vector.multi_reduction <add>, %127, %cst_41 [1] : vector<8x32xf32> to vector<8xf32>
    %129 = vector.shape_cast %128 : vector<8xf32> to vector<8x1xf32>
    %cst_42 = arith.constant 3.200000e+01 : f32
    %130 = vector.broadcast %cst_42 : f32 to vector<8x1xf32>
    %131 = arith.divf %129, %130 : vector<8x1xf32>
    %132 = vector.broadcast %124 : vector<8x1xf32> to vector<8x32xf32>
    %133 = arith.subf %118, %132 : vector<8x32xf32>
    %cst_43 = arith.constant 9.99999974E-6 : f32
    %134 = vector.broadcast %cst_43 : f32 to vector<8x1xf32>
    %135 = arith.addf %131, %134 : vector<8x1xf32>
    %136 = math.rsqrt %135 : vector<8x1xf32>
    %137 = vector.broadcast %136 : vector<8x1xf32> to vector<8x32xf32>
    %138 = arith.mulf %133, %137 : vector<8x32xf32>
    %139 = vector.broadcast %119 : vector<1x32xf32> to vector<8x32xf32>
    %140 = arith.mulf %138, %139 : vector<8x32xf32>
    %141 = vector.broadcast %120 : vector<1x32xf32> to vector<8x32xf32>
    %142 = arith.addf %140, %141 : vector<8x32xf32>
    %143 = arith.truncf %142 : vector<8x32xf32> to vector<8x32xbf16>
    %c0_44 = arith.constant 0 : index
    %c0_45 = arith.constant 0 : index
    %144 = vector.load %arg9[%c0_44, %c0_45] : memref<32x64xbf16, #tpu.memory_space<vmem>>, vector<32x64xbf16>
    %cst_46 = arith.constant dense<0.000000e+00> : vector<8x64xf32>
    %145 = tpu.matmul %143, %144, %cst_46 {dimension_numbers = #tpu.dot_dimension_numbers<[1], [0], [0], [1], [0, 0, 1, 1], [], []>} : vector<8x32xbf16>, vector<32x64xbf16>, vector<8x64xf32> -> vector<8x64xf32>
    %c0_47 = arith.constant 0 : index
    %c0_48 = arith.constant 0 : index
    %146 = vector.load %arg10[%c0_47, %c0_48] : memref<1x64xf32, #tpu.memory_space<vmem>>, vector<1x64xf32>
    %147 = vector.broadcast %146 : vector<1x64xf32> to vector<8x64xf32>
    %148 = arith.addf %145, %147 : vector<8x64xf32>
    %cst_49 = arith.constant 0.000000e+00 : f32
    %149 = vector.broadcast %cst_49 : f32 to vector<8x64xf32>
    %150 = arith.maximumf %148, %149 : vector<8x64xf32>
    %151 = arith.truncf %150 : vector<8x64xf32> to vector<8x64xbf16>
    %c0_50 = arith.constant 0 : index
    %c0_51 = arith.constant 0 : index
    %152 = vector.load %arg11[%c0_50, %c0_51] : memref<64x32xbf16, #tpu.memory_space<vmem>>, vector<64x32xbf16>
    %cst_52 = arith.constant dense<0.000000e+00> : vector<8x32xf32>
    %153 = tpu.matmul %151, %152, %cst_52 {dimension_numbers = #tpu.dot_dimension_numbers<[1], [0], [0], [1], [0, 0, 1, 1], [], []>} : vector<8x64xbf16>, vector<64x32xbf16>, vector<8x32xf32> -> vector<8x32xf32>
    %c0_53 = arith.constant 0 : index
    %c0_54 = arith.constant 0 : index
    %154 = vector.load %arg12[%c0_53, %c0_54] : memref<1x32xf32, #tpu.memory_space<vmem>>, vector<1x32xf32>
    %155 = vector.broadcast %154 : vector<1x32xf32> to vector<8x32xf32>
    %156 = arith.addf %153, %155 : vector<8x32xf32>
    %157 = arith.addf %142, %156 : vector<8x32xf32>
    %c0_55 = arith.constant 0 : index
    %c0_56 = arith.constant 0 : index
    %158 = vector.load %arg13[%c0_55, %c0_56] : memref<1x32xf32, #tpu.memory_space<vmem>>, vector<1x32xf32>
    %c0_57 = arith.constant 0 : index
    %c0_58 = arith.constant 0 : index
    %159 = vector.load %arg14[%c0_57, %c0_58] : memref<1x32xf32, #tpu.memory_space<vmem>>, vector<1x32xf32>
    %cst_59 = arith.constant dense<0.000000e+00> : vector<8xf32>
    %160 = vector.multi_reduction <add>, %157, %cst_59 [1] : vector<8x32xf32> to vector<8xf32>
    %161 = vector.shape_cast %160 : vector<8xf32> to vector<8x1xf32>
    %cst_60 = arith.constant 3.200000e+01 : f32
    %162 = vector.broadcast %cst_60 : f32 to vector<8x1xf32>
    %163 = arith.divf %161, %162 : vector<8x1xf32>
    %164 = vector.broadcast %163 : vector<8x1xf32> to vector<8x32xf32>
    %165 = arith.subf %157, %164 : vector<8x32xf32>
    %166 = arith.mulf %165, %165 : vector<8x32xf32>
    %cst_61 = arith.constant dense<0.000000e+00> : vector<8xf32>
    %167 = vector.multi_reduction <add>, %166, %cst_61 [1] : vector<8x32xf32> to vector<8xf32>
    %168 = vector.shape_cast %167 : vector<8xf32> to vector<8x1xf32>
    %cst_62 = arith.constant 3.200000e+01 : f32
    %169 = vector.broadcast %cst_62 : f32 to vector<8x1xf32>
    %170 = arith.divf %168, %169 : vector<8x1xf32>
    %171 = vector.broadcast %163 : vector<8x1xf32> to vector<8x32xf32>
    %172 = arith.subf %157, %171 : vector<8x32xf32>
    %cst_63 = arith.constant 9.99999974E-6 : f32
    %173 = vector.broadcast %cst_63 : f32 to vector<8x1xf32>
    %174 = arith.addf %170, %173 : vector<8x1xf32>
    %175 = math.rsqrt %174 : vector<8x1xf32>
    %176 = vector.broadcast %175 : vector<8x1xf32> to vector<8x32xf32>
    %177 = arith.mulf %172, %176 : vector<8x32xf32>
    %178 = vector.broadcast %158 : vector<1x32xf32> to vector<8x32xf32>
    %179 = arith.mulf %177, %178 : vector<8x32xf32>
    %180 = vector.broadcast %159 : vector<1x32xf32> to vector<8x32xf32>
    %181 = arith.addf %179, %180 : vector<8x32xf32>
    %c0_64 = arith.constant 0 : index
    %c0_65 = arith.constant 0 : index
    %c0_66 = arith.constant 0 : index
    %182 = vector.load %arg15[%c0_64, %c0_65, %c0_66] : memref<1x8x32xf32, #tpu.memory_space<vmem>>, vector<1x8x32xf32>
    %183 = vector.shape_cast %182 : vector<1x8x32xf32> to vector<8x32xf32>
    %184 = vector.shape_cast %181 : vector<8x32xf32> to vector<1x8x32xf32>
    tpu.vector_store %arg15[%c0_64, %c0_65, %c0_66], %184 {strides = array<i32>} : memref<1x8x32xf32, #tpu.memory_space<vmem>>, vector<1x8x32xf32>,
    return
  }
  func.func @transform_0(%arg0: i32, %arg1: memref<2xi32, #tpu.memory_space<smem>>) -> (i32, i32, i32) {
    %c0_i32 = arith.constant 0 : i32
    %c0_i32_0 = arith.constant 0 : i32
    %c0_i32_1 = arith.constant 0 : i32
    return %arg0, %c0_i32, %c0_i32_0 : i32, i32, i32
  }
  func.func @transform_1(%arg0: i32, %arg1: memref<2xi32, #tpu.memory_space<smem>>) -> (i32, i32) {
    %c0_i32 = arith.constant 0 : i32
    %c0_i32_0 = arith.constant 0 : i32
    %c0_i32_1 = arith.constant 0 : i32
    return %c0_i32, %c0_i32_0 : i32, i32
  }
  func.func @transform_2(%arg0: i32, %arg1: memref<2xi32, #tpu.memory_space<smem>>) -> (i32, i32) {
    %c0_i32 = arith.constant 0 : i32
    %c0_i32_0 = arith.constant 0 : i32
    %c0_i32_1 = arith.constant 0 : i32
    return %c0_i32, %c0_i32_0 : i32, i32
  }
  func.func @transform_3(%arg0: i32, %arg1: memref<2xi32, #tpu.memory_space<smem>>) -> (i32, i32) {
    %c0_i32 = arith.constant 0 : i32
    %c0_i32_0 = arith.constant 0 : i32
    %c0_i32_1 = arith.constant 0 : i32
    return %c0_i32, %c0_i32_0 : i32, i32
  }
  func.func @transform_4(%arg0: i32, %arg1: memref<2xi32, #tpu.memory_space<smem>>) -> (i32, i32) {
    %c0_i32 = arith.constant 0 : i32
    %c0_i32_0 = arith.constant 0 : i32
    %c0_i32_1 = arith.constant 0 : i32
    return %c0_i32, %c0_i32_0 : i32, i32
  }
  func.func @transform_5(%arg0: i32, %arg1: memref<2xi32, #tpu.memory_space<smem>>) -> (i32, i32) {
    %c0_i32 = arith.constant 0 : i32
    %c0_i32_0 = arith.constant 0 : i32
    %c0_i32_1 = arith.constant 0 : i32
    return %c0_i32, %c0_i32_0 : i32, i32
  }
  func.func @transform_6(%arg0: i32, %arg1: memref<2xi32, #tpu.memory_space<smem>>) -> (i32, i32) {
    %c0_i32 = arith.constant 0 : i32
    %c0_i32_0 = arith.constant 0 : i32
    %c0_i32_1 = arith.constant 0 : i32
    return %c0_i32, %c0_i32_0 : i32, i32
  }
  func.func @transform_7(%arg0: i32, %arg1: memref<2xi32, #tpu.memory_space<smem>>) -> (i32, i32) {
    %c0_i32 = arith.constant 0 : i32
    %c0_i32_0 = arith.constant 0 : i32
    %c0_i32_1 = arith.constant 0 : i32
    return %c0_i32, %c0_i32_0 : i32, i32
  }
  func.func @transform_8(%arg0: i32, %arg1: memref<2xi32, #tpu.memory_space<smem>>) -> (i32, i32) {
    %c0_i32 = arith.constant 0 : i32
    %c0_i32_0 = arith.constant 0 : i32
    %c0_i32_1 = arith.constant 0 : i32
    return %c0_i32, %c0_i32_0 : i32, i32
  }
  func.func @transform_9(%arg0: i32, %arg1: memref<2xi32, #tpu.memory_space<smem>>) -> (i32, i32) {
    %c0_i32 = arith.constant 0 : i32
    %c0_i32_0 = arith.constant 0 : i32
    %c0_i32_1 = arith.constant 0 : i32
    return %c0_i32, %c0_i32_0 : i32, i32
  }
  func.func @transform_10(%arg0: i32, %arg1: memref<2xi32, #tpu.memory_space<smem>>) -> (i32, i32) {
    %c0_i32 = arith.constant 0 : i32
    %c0_i32_0 = arith.constant 0 : i32
    %c0_i32_1 = arith.constant 0 : i32
    return %c0_i32, %c0_i32_0 : i32, i32
  }
  func.func @transform_11(%arg0: i32, %arg1: memref<2xi32, #tpu.memory_space<smem>>) -> (i32, i32) {
    %c0_i32 = arith.constant 0 : i32
    %c0_i32_0 = arith.constant 0 : i32
    %c0_i32_1 = arith.constant 0 : i32
    return %c0_i32, %c0_i32_0 : i32, i32
  }
  func.func @transform_12(%arg0: i32, %arg1: memref<2xi32, #tpu.memory_space<smem>>) -> (i32, i32) {
    %c0_i32 = arith.constant 0 : i32
    %c0_i32_0 = arith.constant 0 : i32
    %c0_i32_1 = arith.constant 0 : i32
    return %c0_i32, %c0_i32_0 : i32, i32
  }
  func.func @transform_13(%arg0: i32, %arg1: memref<2xi32, #tpu.memory_space<smem>>) -> (i32, i32, i32) {
    %c0_i32 = arith.constant 0 : i32
    %c0_i32_0 = arith.constant 0 : i32
    %c0_i32_1 = arith.constant 0 : i32
    return %arg0, %c0_i32, %c0_i32_0 : i32, i32, i32
  }
}

module attributes {stable_mosaic.version = 11 : i64} {
  func.func @_nsp_kernel(%arg0: i32, %arg1: memref<2x32xf32, #tpu.memory_space<vmem>>, %arg2: memref<32x32xbf16, #tpu.memory_space<vmem>>, %arg3: memref<1x32xf32, #tpu.memory_space<vmem>>, %arg4: memref<32x2xbf16, #tpu.memory_space<vmem>>, %arg5: memref<1x2xf32, #tpu.memory_space<vmem>>, %arg6: memref<2x2xf32, #tpu.memory_space<vmem>>) attributes {dimension_semantics = [#tpu.dimension_semantics<arbitrary>], iteration_bounds = array<i64: 1>, scalar_prefetch = 0 : i64, scratch_operands = 0 : i64, tpu.core_type = #tpu.core_type<tc>, window_params = [{pipeline_mode = #tpu.pipeline_mode<synchronous>, transform_indices = @transform_0, window_bounds = array<i64: 2, 32>}, {pipeline_mode = #tpu.pipeline_mode<synchronous>, transform_indices = @transform_1, window_bounds = array<i64: 32, 32>}, {pipeline_mode = #tpu.pipeline_mode<synchronous>, transform_indices = @transform_2, window_bounds = array<i64: 1, 32>}, {pipeline_mode = #tpu.pipeline_mode<synchronous>, transform_indices = @transform_3, window_bounds = array<i64: 32, 2>}, {pipeline_mode = #tpu.pipeline_mode<synchronous>, transform_indices = @transform_4, window_bounds = array<i64: 1, 2>}, {pipeline_mode = #tpu.pipeline_mode<synchronous>, transform_indices = @transform_5, window_bounds = array<i64: 2, 2>}]} {
    %c0 = arith.constant 0 : index
    %c0_0 = arith.constant 0 : index
    %0 = vector.load %arg1[%c0, %c0_0] : memref<2x32xf32, #tpu.memory_space<vmem>>, vector<2x32xf32>
    %1 = arith.truncf %0 : vector<2x32xf32> to vector<2x32xbf16>
    %c0_1 = arith.constant 0 : index
    %c0_2 = arith.constant 0 : index
    %2 = vector.load %arg2[%c0_1, %c0_2] : memref<32x32xbf16, #tpu.memory_space<vmem>>, vector<32x32xbf16>
    %cst = arith.constant dense<0.000000e+00> : vector<2x32xf32>
    %3 = tpu.matmul %1, %2, %cst {dimension_numbers = #tpu.dot_dimension_numbers<[1], [0], [0], [1], [0, 0, 1, 1], [], []>} : vector<2x32xbf16>, vector<32x32xbf16>, vector<2x32xf32> -> vector<2x32xf32>
    %c0_3 = arith.constant 0 : index
    %c0_4 = arith.constant 0 : index
    %4 = vector.load %arg3[%c0_3, %c0_4] : memref<1x32xf32, #tpu.memory_space<vmem>>, vector<1x32xf32>
    %5 = vector.broadcast %4 : vector<1x32xf32> to vector<2x32xf32>
    %6 = arith.addf %3, %5 : vector<2x32xf32>
    %7 = math.tanh %6 : vector<2x32xf32>
    %8 = arith.truncf %7 : vector<2x32xf32> to vector<2x32xbf16>
    %c0_5 = arith.constant 0 : index
    %c0_6 = arith.constant 0 : index
    %9 = vector.load %arg4[%c0_5, %c0_6] : memref<32x2xbf16, #tpu.memory_space<vmem>>, vector<32x2xbf16>
    %cst_7 = arith.constant dense<0.000000e+00> : vector<2x2xf32>
    %10 = tpu.matmul %8, %9, %cst_7 {dimension_numbers = #tpu.dot_dimension_numbers<[1], [0], [0], [1], [0, 0, 1, 1], [], []>} : vector<2x32xbf16>, vector<32x2xbf16>, vector<2x2xf32> -> vector<2x2xf32>
    %c0_8 = arith.constant 0 : index
    %c0_9 = arith.constant 0 : index
    %11 = vector.load %arg5[%c0_8, %c0_9] : memref<1x2xf32, #tpu.memory_space<vmem>>, vector<1x2xf32>
    %12 = vector.broadcast %11 : vector<1x2xf32> to vector<2x2xf32>
    %13 = arith.addf %10, %12 : vector<2x2xf32>
    %c0_10 = arith.constant 0 : index
    %c0_11 = arith.constant 0 : index
    %14 = vector.load %arg6[%c0_10, %c0_11] : memref<2x2xf32, #tpu.memory_space<vmem>>, vector<2x2xf32>
    tpu.vector_store %arg6[%c0_10, %c0_11], %13 {strides = array<i32>} : memref<2x2xf32, #tpu.memory_space<vmem>>, vector<2x2xf32>,
    return
  }
  func.func @transform_0(%arg0: i32) -> (i32, i32) {
    %c0_i32 = arith.constant 0 : i32
    %c0_i32_0 = arith.constant 0 : i32
    %c0_i32_1 = arith.constant 0 : i32
    return %c0_i32, %c0_i32_0 : i32, i32
  }
  func.func @transform_1(%arg0: i32) -> (i32, i32) {
    %c0_i32 = arith.constant 0 : i32
    %c0_i32_0 = arith.constant 0 : i32
    %c0_i32_1 = arith.constant 0 : i32
    return %c0_i32, %c0_i32_0 : i32, i32
  }
  func.func @transform_2(%arg0: i32) -> (i32, i32) {
    %c0_i32 = arith.constant 0 : i32
    %c0_i32_0 = arith.constant 0 : i32
    %c0_i32_1 = arith.constant 0 : i32
    return %c0_i32, %c0_i32_0 : i32, i32
  }
  func.func @transform_3(%arg0: i32) -> (i32, i32) {
    %c0_i32 = arith.constant 0 : i32
    %c0_i32_0 = arith.constant 0 : i32
    %c0_i32_1 = arith.constant 0 : i32
    return %c0_i32, %c0_i32_0 : i32, i32
  }
  func.func @transform_4(%arg0: i32) -> (i32, i32) {
    %c0_i32 = arith.constant 0 : i32
    %c0_i32_0 = arith.constant 0 : i32
    %c0_i32_1 = arith.constant 0 : i32
    return %c0_i32, %c0_i32_0 : i32, i32
  }
  func.func @transform_5(%arg0: i32) -> (i32, i32) {
    %c0_i32 = arith.constant 0 : i32
    %c0_i32_0 = arith.constant 0 : i32
    %c0_i32_1 = arith.constant 0 : i32
    return %c0_i32, %c0_i32_0 : i32, i32
  }
}

</mosaic_0001>

<bundles_post_ra>
// kernel: bert_forward.7
= control target key start
LH: loop header
LB: loop body
LE: loop exit
PB: predicated region body
PF: predicated region fallthrough
CT: control target
= control target key end

     0   :  { %v238_v1 = vmov 0.0   ;;  %vm239_vm0 = vmmov 0   ;;  %s306_s0 = inlined_call_operand.vmem [shape: f32[2,32], index: 0, kind: input, shape index: {}]   ;;  %s307_s1 = inlined_call_operand.vmem [shape: bf16[32,32], index: 1, kind: input, shape index: {}]   ;;  %s308_s2 = inlined_call_operand.vmem [shape: f32[1,32], index: 2, kind: input, shape index: {}]   ;;  %s309_s3 = inlined_call_operand.vmem [shape: bf16[32,2], index: 3, kind: input, shape index: {}]   ;;  %s310_s4 = inlined_call_operand.vmem [shape: f32[1,2], index: 4, kind: input, shape index: {}]   ;;  %s311_s5 = inlined_call_operand.hbm [shape: f32[2,2], index: 5, kind: output, shape index: {}]  }
   0x1   :  { %v208_v0 = vld [vmem:[%s307_s1] sm:$0xff]   ;;  %189 = vmatprep.subr.bf16.mxu0 %v238_v1  ;;  %197 = vmatprep.subr.bf16.mxu1 %v238_v1  ;;  %v209_v2 = vld [vmem:[%s307_s1 + $0x8] sm:$0xff]  }
   0x2   :  { %190 = vmatpush3.bf16.msra.mxu0 %v208_v0  ;;  %193 = vmatprep.mubr.msk.bf16.mxu0 %vm239_vm0, %v238_v1  ;;  %v22_v3 = vld [vmem:[%s306_s0] sm:$0x3] }
   0x3   :  { %191 = vmatprep.subr.bf16.mxu0 %v238_v1  ;;  %201 = vmatprep.mubr.msk.bf16.mxu1 %vm239_vm0, %v238_v1 }
   0x4   :  { %10 = vsyncpa [#allocation3], 0  ;;  %v23_v4 = vpack.c.bf16 %v22_v3, %v22_v3  ;;  %vm47_vm1 = vcmask 261120   ;;  %v210_v5 = vld [vmem:[%s309_s3] sm:$0xff]   ;;  %v211_v6 = vld [vmem:[%s309_s3 + $0x8] sm:$0xff]   ;;  %s240_s3 = smov [#allocation2]  }
   0x5   :  { %198 = vmatpush3.bf16.msra.mxu1 %v210_v5  ;;  %v175_v7 = vld [vmem:[%s308_s2] ss:$0 sm:$0xff]  ;;  %s167_s30 = sshll.u32 %s240_s3, 4  ;;  %vm159_vm2 = vcmask 9216   ;;  %s168_s30 = int_to_ptr.vmem [resolvable:$true] %s167_s30 }
   0x6   :  { %192 = vmatpush3.bf16.msra.mxu0 %v209_v2  ;;  %199 = vmatprep.subr.bf16.mxu1 %v238_v1  ;;  %v179_v15 = vld [vmem:[%s310_s4] ss:$0 sm:$0xff]  ;;  %s214_s2 = scalar_lea.vmem %s168_s30, 32  ;;  %p219_p1 = scmp.lt.s32.totalorder %s168_s30, %s168_s30 }
   0x7   :  { %p215_p0 = scmp.ne.s32.totalorder %s168_s30, %s214_s2  ;;  %p220_p2 = scmp.lt.s32.totalorder %s214_s2, %s214_s2 }
   0x9   :  { %194 = vmatmul.mubr.msk.bf16.vlgmr.msra.gmra.mrb[0].mxu0 %vm47_vm1, %v23_v4  ;;  %200 = vmatpush3.bf16.msra.mxu1 %v211_v6  ;;  %p221_p3 = por %p220_p2, %p219_p1 }
   0xb   :  { %p222_p4 = pnand %p221_p3, %p215_p0 }
  0xdc   :  { %v85_v8 = vpop.f32.mrb[0].mxu0 }
  0xdd   :  { %v86_v9 = vadd.f32 %v175_v7, %v85_v8  ;;  %v195_v10 = vpop.f32.mrb[1].mxu0 }
  0xde   :  { %v88_v11 = vpop.f32.mrb[2].mxu0 }
  0xdf   :  { %212 = vtanh.f32 %v86_v9  ;;  %v196_v12 = vpop.f32.mrb[3].mxu0 }
  0xe9   :  { %v213_v13 = vpop.eup %212 }
  0xea   :  { %v92_v14 = vpack.c.bf16 %v213_v13, %v213_v13 }
  0xec   :  { %202 = vmatmul.mubr.msk.bf16.vlgmr.msra.gmra.mrb[0].mxu1 %vm47_vm1, %v92_v14 }
 0x1bf   :  { %v153_v16 = vpop.f32.mrb[0].mxu1 }
 0x1c0   :  { %v154_v17 = vadd.f32 %v179_v15, %v153_v16  ;;  %v203_v18 = vpop.f32.mrb[1].mxu1 }
 0x1c1   :  { %v156_v19 = vpop.f32.mrb[2].mxu1 }
 0x1c2   :  { %v204_v20 = vpop.f32.mrb[3].mxu1  ;;  %160 = vst.msk [vmem:[#allocation2] sm:$0x3] %vm159_vm2, %v154_v17 }
 0x1c3   :  { %225 = shalt.err (!%p222_p4)
}
 0x1c4   :  { %s226_s4 = scalar_lea.hbm %s311_s5, 32 }
 0x1c5   :  { %p227_p5 = scmp.ne.s32.totalorder %s311_s5, %s226_s4  ;;  %p230_p6 = scmp.lt.u32.totalorder %s226_s4, %s311_s5 }
 0x1c7   :  { %p232_p7 = pnand %p230_p6, %p227_p5 }
 0x1c9   :  { %235 = shalt.err (!%p232_p7)
}
 0x1ca   :  { %170 = dma.vmem_to_hbm [thread:$0]  %s168_s30, 32, %s311_s5, [#allocation3]  }
 0x1cb   :  { %236 = dma.done.wait [#allocation3], 32  }
 0x1cc   :  { %237 = vsyncadd [#allocation3], 4294967264 }
 0x1cd   :  { %174 = vsyncpa [#allocation3], 1 }

// kernel: bert_forward.6
= control target key start
LH: loop header
LB: loop body
LE: loop exit
PB: predicated region body
PF: predicated region fallthrough
CT: control target
= control target key end

     0   :  { %v240_v0 = vmov 0.0   ;;  %vm241_vm0 = vmmov 0   ;;  %vm52_vm1 = vcmask 261120   ;;  %vm99_vm2 = vcmask 259072   ;;  %s314_s1 = inlined_call_operand.vmem [shape: bf16[32,32], index: 1, kind: input, shape index: {}]   ;;  %s315_s0 = inlined_call_operand.vmem [shape: f32[6,32], index: 0, kind: input, shape index: {}]   ;;  %s316_s2 = inlined_call_operand.vmem [shape: f32[1,32], index: 2, kind: input, shape index: {}]   ;;  %s317_s5 = inlined_call_operand.vmem [shape: bf16[32,128], index: 5, kind: input, shape index: {}]   ;;  %s318_s3 = inlined_call_operand.vmem [shape: f32[1,32], index: 3, kind: input, shape index: {}]   ;;  %s319_s4 = inlined_call_operand.vmem [shape: f32[1,32], index: 4, kind: input, shape index: {}]   ;;  %s320_s6 = inlined_call_operand.vmem [shape: f32[1,128], index: 6, kind: input, shape index: {}]   ;;  %s321_s7 = inlined_call_operand.vmem [shape: f32[6,128], index: 7, kind: output, shape index: {}]  }
   0x1   :  { %216 = vmatprep.subr.bf16.mxu0 %v240_v0  ;;  %v234_v1 = vld [vmem:[%s314_s1] sm:$0xff]   ;;  %220 = vmatprep.mubr.msk.bf16.mxu0 %vm241_vm0, %v240_v0  ;;  %v235_v2 = vld [vmem:[%s314_s1 + $0x8] sm:$0xff]  }
   0x2   :  { %224 = vmatprep.subr.bf16.mxu1 %v240_v0  ;;  %228 = vmatprep.mubr.msk.bf16.mxu1 %vm241_vm0, %v240_v0  ;;  %v27_v3 = vld [vmem:[%s315_s0] sm:$0x3f]  ;;  %v237_v19 = vld [vmem:[%s317_s5 + $0x8] sm:$0xff]  }
   0x3   :  { %217 = vmatpush3.bf16.msra.mxu0 %v234_v1  ;;  %v28_v4 = vpack.c.bf16 %v27_v3, %v27_v3  ;;  %v200_v5 = vld [vmem:[%s316_s2] ss:$0 sm:$0xff] }
   0x4   :  { %218 = vmatprep.subr.bf16.mxu0 %v240_v0  ;;  %v236_v18 = vld [vmem:[%s317_s5] sm:$0xff]  }
   0x5   :  { %225 = vmatpush3.bf16.msra.mxu1 %v236_v18  ;;  %v204_v24 = vld [vmem:[%s318_s3] ss:$0 sm:$0xff] }
   0x6   :  { %226 = vmatprep.subr.bf16.mxu1 %v240_v0  ;;  %v205_v26 = vld [vmem:[%s319_s4] ss:$0 sm:$0xff] }
   0x7   :  { %219 = vmatpush3.bf16.msra.mxu0 %v235_v2  ;;  %v206_v30 = vld [vmem:[%s320_s6] ss:$0 sm:$0xff] }
   0x9   :  { %227 = vmatpush3.bf16.msra.mxu1 %v237_v19 }
   0xa   :  { %221 = vmatmul.mubr.msk.bf16.vlgmr.msra.gmra.mrb[0].mxu0 %vm52_vm1, %v28_v4 }
  0xdd   :  { %v90_v6 = vpop.f32.mrb[0].mxu0 }
  0xde   :  { %v91_v7 = vadd.f32 %v200_v5, %v90_v6  ;;  %v222_v8 = vpop.f32.mrb[1].mxu0 }
  0xdf   :  { %v93_v9 = vpop.f32.mrb[2].mxu0 }
  0xe0   :  { %v96_v10 = vmax.f32 %v91_v7, 0.0  ;;  %v223_v11 = vpop.f32.mrb[3].mxu0 }
  0xe2   :  { %v100_v12 = vsel %vm99_vm2, %v96_v10, 0.0 }
  0xe3   :  { %101 = vadd.xlane.f32.xlu0 %v100_v12 }
 0x170   :  { %v102_v13 = vpop.xlane.xlu0 %101 }
 0x171   :  { %v104_v14 = vmul.f32 0.03125, %v102_v13 }
 0x173   :  { %v105_v15 = vsub.f32 %v96_v10, %v104_v14 }
 0x175   :  { %v106_v16 = vmul.f32 %v105_v15, %v105_v15 }
 0x177   :  { %v107_v17 = vsel %vm99_vm2, %v106_v16, 0.0 }
 0x178   :  { %108 = vadd.xlane.f32.xlu0 %v107_v17 }
 0x205   :  { %v109_v20 = vpop.xlane.xlu0 %108 }
 0x206   :  { %v110_v21 = vmul.f32 0.03125, %v109_v20 }
 0x208   :  { %v111_v22 = vadd.f32 1e-05, %v110_v21 }
 0x20a   :  { %238 = vrsqrt.f32 %v111_v22 }
 0x214   :  { %v239_v23 = vpop.eup %238 }
 0x215   :  { %v113_v25 = vmul.f32 %v239_v23, %v105_v15 }
 0x217   :  { %v120_v27 = vmul.f32 %v204_v24, %v113_v25 }
 0x219   :  { %v127_v28 = vadd.f32 %v205_v26, %v120_v27 }
 0x21b   :  { %v128_v29 = vpack.c.bf16 %v127_v28, %v127_v28 }
 0x21d   :  { %229 = vmatmul.mubr.msk.bf16.vlgmr.msra.gmra.mrb[0].mxu1 %vm52_vm1, %v128_v29 }
 0x2f0   :  { %v189_v31 = vpop.f32.mrb[0].mxu1 }
 0x2f1   :  { %v190_v32 = vadd.f32 %v206_v30, %v189_v31  ;;  %v230_v33 = vpop.f32.mrb[1].mxu1 }
 0x2f2   :  { %v192_v34 = vpop.f32.mrb[2].mxu1 }
 0x2f3   :  { %195 = vst [vmem:[%s321_s7] sm:$0x3f] %v190_v32  ;;  %v231_v35 = vpop.f32.mrb[3].mxu1 }

// kernel: bert_forward.4
= control target key start
LH: loop header
LB: loop body
LE: loop exit
PB: predicated region body
PF: predicated region fallthrough
CT: control target
= control target key end

     0   :  { %s1833_s0 = inlined_call_operand.vmem [shape: s32[2], index: 0, kind: input, shape index: {}]   ;;  %s1834_s1 = inlined_call_operand.vmem [shape: f32[2,8,32], index: 1, kind: input, shape index: {}]   ;;  %s1835_s2 = inlined_call_operand.vmem [shape: bf16[32,96], index: 2, kind: input, shape index: {}]   ;;  %s1836_s3 = inlined_call_operand.vmem [shape: f32[1,96], index: 3, kind: input, shape index: {}]   ;;  %s1837_s4 = inlined_call_operand.vmem [shape: bf16[32,32], index: 4, kind: input, shape index: {}]   ;;  %s1838_s5 = inlined_call_operand.vmem [shape: f32[1,32], index: 5, kind: input, shape index: {}]   ;;  %s1839_s6 = inlined_call_operand.vmem [shape: f32[1,32], index: 6, kind: input, shape index: {}]   ;;  %s1840_s7 = inlined_call_operand.vmem [shape: f32[1,32], index: 7, kind: input, shape index: {}]   ;;  %s1841_s8 = inlined_call_operand.vmem [shape: bf16[32,64], index: 8, kind: input, shape index: {}]   ;;  %s1842_s9 = inlined_call_operand.vmem [shape: f32[1,64], index: 9, kind: input, shape index: {}]   ;;  %s1843_s10 = inlined_call_operand.vmem [shape: bf16[64,32], index: 10, kind: input, shape index: {}]   ;;  %s1844_s11 = inlined_call_operand.vmem [shape: f32[1,32], index: 11, kind: input, shape index: {}]   ;;  %s1845_s12 = inlined_call_operand.vmem [shape: f32[1,32], index: 12, kind: input, shape index: {}]   ;;  %s1846_s13 = inlined_call_operand.vmem [shape: f32[1,32], index: 13, kind: input, shape index: {}]   ;;  %s1847_s14 = inlined_call_operand.vmem [shape: f32[2,8,32], index: 14, kind: output, shape index: {}]  }
   0x1   :  { %s19_s15 = sshll.u32 %s1833_s0, 4  ;;  %s20_s15 = int_to_ptr.vmem [resolvable:$true] %s19_s15 }
   0x2   :  { %s1527_s16 = scalar_lea.vmem %s20_s15, 16  ;;  %p1532_p1 = scmp.lt.s32.totalorder %s20_s15, %s20_s15 }
   0x3   :  { %p1528_p0 = scmp.ne.s32.totalorder %s20_s15, %s1527_s16  ;;  %p1533_p2 = scmp.lt.s32.totalorder %s1527_s16, %s1527_s16 }
   0x5   :  { %p1534_p3 = por %p1533_p2, %p1532_p1 }
   0x7   :  { %p1535_p4 = pnand %p1534_p3, %p1528_p0 }
   0x9   :  { %1538 = shalt.err (!%p1535_p4)  }
   0xa   :  { %s1549_s17 = smov [#allocation3]  }
   0xb   :  { %22 = dma.vmem_to_smem %s20_s15, 16, %s1549_s17, [#allocation2] }
   0xc   :  { %1543 = dma.done.wait [#allocation2], 16 }
   0xd   :  { %1544 = vsyncadd [#allocation2], 4294967280 }
   0xe   :  { %24 = sfence }
   0xf   :  { %s1644_s18 = smov 0  }
  0x10 LB: > { %s1650_s0 = sadd.s32 4294967295, %s1547_s18   ;;  %p1323_p5 = scmp.ge.s32.totalorder %s1547_s18, 1  ;;  %s1547_s18 = sphi %s1644_s18, %s30_s18  }
  0x11   : > { %p393_p6 = scmp.lt.s32.totalorder %s1547_s18, 3 }
  0x13   : > { %p394_p7 = pnand %p1323_p5, %p393_p6 }
  0x14   : > { %v1497_v0 = vld [vmem:[%s1835_s2] sm:$0xff] (!%p394_p7)   ;;  %v1550_v1 = vmov (!%p394_p7), 0.0   ;;  %v1498_v2 = vld [vmem:[%s1835_s2 + $0x8] sm:$0xff] (!%p394_p7)   ;;  %vm1551_vm0 = vmmov (!%p394_p7), 0   ;;  %p435_p8 = scmp.lt.s32.totalorder (!%p394_p7), %s1650_s0, 1  ;;  %vm470_vm1 = vcmask (!%p394_p7), 261120   ;;  %v514_v23 = vlaneseq (!%p394_p7) }
  0x15   : > { %397 = sbr.rel (%p394_p7) target bundleno = 2576 (0xa10), region = 72  ;;  %1388 = vmatprep.subr.bf16.mxu0 (!%p394_p7), %v1550_v1  ;;  %1396 = vmatprep.subr.bf16.mxu1 (!%p394_p7), %v1550_v1  ;;  %v1326_v5 = vld [vmem:[%s1836_s3] ss:$0 sm:$0xff] (!%p394_p7)  ;;  %s1552_s30 = smov (!%p394_p7), 120   ;;  %vm520_vm2 = vcmask (!%p394_p7), 64512   ;;  %vm588_vm4 = vcmask (!%p394_p7), 1043456  }
  0x16   : > { %1389 = vmatpush3.bf16.msra.mxu0 (!%p394_p7), %v1497_v0  ;;  %1392 = vmatprep.mubr.msk.bf16.mxu0 (!%p394_p7), %vm1551_vm0, %v1550_v1  ;;  %s1553_s15 = smov (!%p394_p7), 96   ;;  %s1554_s16 = smov (!%p394_p7), 80   ;;  %v515_v24 = vand.u32 (!%p394_p7), 127, %v514_v23  ;;  %vm981_vm5 = vcmask (!%p394_p7), 130048   ;;  %vm983_vm6 = vcmask (!%p394_p7), 195584   ;;  %vm1191_vm7 = vcmask (!%p394_p7), 523264  }
  0x17   : > { %1390 = vmatprep.subr.bf16.mxu0 (!%p394_p7), %v1550_v1  ;;  %1398 = vmatprep.mubr.msk.bf16.mxu1 (!%p394_p7), %vm1551_vm0, %v1550_v1  ;;  %s1555_s17 = smov (!%p394_p7), 88   ;;  %s1556_s19 = smov (!%p394_p7), 72  }
  0x18   : > { %s1557_s20 = smov (!%p394_p7), 112   ;;  %s1558_s21 = smov (!%p394_p7), 104  }
  0x19   : > { %s444_s22 = sld [smem:[#allocation3 + %s1650_s0]] (!%p394_p7)  ;;  %s1560_s25 = smov (!%p394_p7), 64  }
  0x1a   : > { %1391 = vmatpush3.bf16.msra.mxu0 (!%p394_p7), %v1498_v2  ;;  %s1561_s26 = smov (!%p394_p7), 40   ;;  %s1563_s28 = smov (!%p394_p7), 8  }
  0x1b   : > { %1402 = vmatprep.subr.bf16.mxu0 (!%p394_p7), %v1550_v1 }
  0x1c   : > { %s1669_s23 = scalar_select %p435_p8, %s1650_s0, 1 }
  0x1d   : > { %s1559_s0 = smov 56  }
  0x1e   : > { %s1324_s24 = sshll.u32 %s1669_s23, 3 }
  0x1f   : > { %s438_s27 = scalar_lea.vmem %s1834_s1, %s1324_s24  ;;  %v568_v25 = vstv %s444_s22 }
  0x20   : > { %v1678_v3 = vld [vmem:[%s438_s27] sm:$0xff]  ;;  %vm1719_vm3 = vcmp.lt.s32.totalorder %v515_v24, %v568_v25  ;;  %s1562_s27 = smov 48  }
  0x21   : > { %v446_v4 = vpack.c.bf16 %v1678_v3, %v1678_v3 }
  0x23   : > { %1393 = vmatmul.mubr.msk.bf16.vlgmr.msra.gmra.mrb[0].mxu0 %vm470_vm1, %v446_v4 }
  0x24   : > { %1404 = vmatprep.mubr.msk.bf16.mxu0 %vm1551_vm0, %v1550_v1 }
  0xf6   : > { %v508_v6 = vpop.f32.mrb[0].mxu0 }
  0xf7   : > { %v509_v7 = vadd.f32 %v1326_v5, %v508_v6  ;;  %v1394_v8 = vpop.f32.mrb[1].mxu0 }
  0xf8   : > { %v511_v9 = vpop.f32.mrb[2].mxu0 }
  0xf9   : > { %v1688_v10 = vpack.c.bf16 %v509_v7, %v509_v7  ;;  %v1395_v11 = vpop.f32.mrb[3].mxu0 }
  0xfb   : > { %632 = vrot.lane.b32.xlu1 %v1688_v10, %s1552_s30  ;;  %518 = vrot.lane.b32.xlu0 %v1688_v10, %s1553_s15 }
  0xff   : > { %746 = vrot.lane.b32.xlu1 %v1688_v10, %s1554_s16  ;;  %634 = vrot.lane.b32.xlu0 %v1688_v10, %s1555_s17  ;;  %s1564_s17 = smov 16  }
 0x103   : > { %858 = vrot.lane.b32.xlu1 %v1688_v10, %s1556_s19  ;;  %744 = vrot.lane.b32.xlu0 %v1688_v10, %s1557_s20  ;;  %s1565_s19 = smov 24   ;;  %s442_s20 = scalar_lea.vmem %s1847_s14, %s1324_s24 }
 0x107   : > { %856 = vrot.lane.b32.xlu0 %v1688_v10, %s1558_s21 }
 0x16d   : > { %v519_v12 = vpop.permute.xlu0 %518  ;;  %v633_v15 = vpop.permute.xlu1 %632 }
 0x16e   : > { %v525_v13 = vsel %vm520_vm2, %v519_v12, 0 }
 0x16f   : > { %1397 = vmatpush3.bf16.xpose.msra.mxu1 %v525_v13 }
 0x170   : > { %1408 = vmatprep.subr.bf16.mxu1 %v1550_v1 }
 0x171   : > { %v635_v14 = vpop.permute.xlu0 %634  ;;  %v747_v17 = vpop.permute.xlu1 %746 }
 0x172   : > { %v640_v16 = vsel %vm520_vm2, %v635_v14, 0  ;;  %v752_v18 = vsel %vm520_vm2, %v747_v17, 0 }
 0x175   : > { %v859_v19 = vpop.permute.xlu1 %858  ;;  %v745_v20 = vpop.permute.xlu0 %744 }
 0x176   : > { %1399 = vmatmul.mubr.msk.bf16.vlgmr.msra.gmra.mrb[0].mxu1 %vm520_vm2, %v1688_v10  ;;  %v864_v21 = vsel %vm520_vm2, %v859_v19, 0 }
 0x177   : > { %1409 = vmatpush3.bf16.xpose.msra.mxu1 %v640_v16  ;;  %1410 = vmatprep.mubr.msk.bf16.mxu1 %vm1551_vm0, %v1550_v1 }
 0x178   : > { %1420 = vmatprep.subr.bf16.mxu1 %v1550_v1 }
 0x179   : > { %v857_v22 = vpop.permute.xlu0 %856 }
 0x17e   : > { %1411 = vmatmul.mubr.msk.bf16.vlgmr.msra.gmra.mrb[4].mxu1 %vm520_vm2, %v633_v15 }
 0x17f   : > { %1421 = vmatpush3.bf16.xpose.msra.mxu1 %v752_v18  ;;  %1422 = vmatprep.mubr.msk.bf16.mxu1 %vm1551_vm0, %v1550_v1 }
 0x180   : > { %1432 = vmatprep.subr.bf16.mxu1 %v1550_v1 }
 0x186   : > { %1423 = vmatmul.mubr.msk.bf16.vlgmr.msra.gmra.mrb[8].mxu1 %vm520_vm2, %v745_v20 }
 0x187   : > { %1433 = vmatpush3.bf16.xpose.msra.mxu1 %v864_v21  ;;  %1434 = vmatprep.mubr.msk.bf16.mxu1 %vm1551_vm0, %v1550_v1 }
 0x188   : > { %1444 = vmatprep.subr.bf16.mxu1 %v1550_v1 }
 0x18e   : > { %1435 = vmatmul.mubr.msk.bf16.vlgmr.msra.gmra.mrb[12].mxu1 %vm520_vm2, %v857_v22 }
 0x18f   : > { %1448 = vmatprep.mubr.msk.bf16.mxu1 %vm1551_vm0, %v1550_v1 }
 0x249   : > { %v561_v26 = vpop.f32.mrb[0].mxu1 }
 0x24a   : > { %v567_v28 = vmul.f32 0.35355338, %v561_v26  ;;  %v1400_v29 = vpop.f32.mrb[1].mxu1 }
 0x24b   : > { %v564_v30 = vpop.f32.mrb[2].mxu1 }
 0x24c   : > { %v1401_v31 = vpop.f32.mrb[3].mxu1  ;;  %v570_v32 = vsel %vm1719_vm3, %v567_v28, -1000000.0 }
 0x24d   : > { %v571_v33 = vsel %vm520_vm2, %v570_v32, -inf }
 0x24e   : > { %572 = vmax.xlane.f32.xlu1 %v571_v33 }
 0x251   : > { %v676_v34 = vpop.f32.mrb[4].mxu1 }
 0x252   : > { %v682_v35 = vmul.f32 0.35355338, %v676_v34  ;;  %v1412_v36 = vpop.f32.mrb[5].mxu1 }
 0x253   : > { %v679_v37 = vpop.f32.mrb[6].mxu1 }
 0x254   : > { %v1413_v38 = vpop.f32.mrb[7].mxu1  ;;  %v683_v39 = vsel %vm1719_vm3, %v682_v35, -1000000.0 }
 0x255   : > { %v684_v40 = vsel %vm520_vm2, %v683_v39, -inf }
 0x256   : > { %685 = vmax.xlane.f32.xlu0 %v684_v40 }
 0x259   : > { %v788_v41 = vpop.f32.mrb[8].mxu1 }
 0x25a   : > { %v794_v42 = vmul.f32 0.35355338, %v788_v41  ;;  %v1424_v43 = vpop.f32.mrb[9].mxu1 }
 0x25b   : > { %v791_v44 = vpop.f32.mrb[10].mxu1 }
 0x25c   : > { %v1425_v45 = vpop.f32.mrb[11].mxu1  ;;  %v795_v46 = vsel %vm1719_vm3, %v794_v42, -1000000.0 }
 0x25d   : > { %v796_v47 = vsel %vm520_vm2, %v795_v46, -inf  ;;  %v1499_v45 = vld [vmem:[%s1837_s4] sm:$0xff]  }
 0x25e   : > { %797 = vmax.xlane.f32.xlu0 %v796_v47  ;;  %1445 = vmatpush3.bf16.msra.mxu1 %v1499_v45 }
 0x25f   : > { %1446 = vmatprep.subr.bf16.mxu1 %v1550_v1 }
 0x261   : > { %v900_v48 = vpop.f32.mrb[12].mxu1 }
 0x262   : > { %v906_v49 = vmul.f32 0.35355338, %v900_v48  ;;  %v1436_v50 = vpop.f32.mrb[13].mxu1 }
 0x263   : > { %v903_v51 = vpop.f32.mrb[14].mxu1 }
 0x264   : > { %v1437_v52 = vpop.f32.mrb[15].mxu1  ;;  %v907_v53 = vsel %vm1719_vm3, %v906_v49, -1000000.0 }
 0x265   : > { %v908_v54 = vsel %vm520_vm2, %v907_v53, -inf }
 0x266   : > { %909 = vmax.xlane.f32.xlu1 %v908_v54 }
 0x2db   : > { %v573_v55 = vpop.xlane.xlu1 %572 }
 0x2dc   : > { %v574_v56 = vsub.f32 %v570_v32, %v573_v55 }
 0x2de   : > { %v575_v57 = vmul.f32 1.442695, %v574_v56 }
 0x2e0   : > { %1507 = vpow2.f32 %v575_v57 }
 0x2e3   : > { %v686_v58 = vpop.xlane.xlu0 %685 }
 0x2e4   : > { %v687_v59 = vsub.f32 %v683_v39, %v686_v58 }
 0x2e6   : > { %v688_v60 = vmul.f32 1.442695, %v687_v59 }
 0x2e8   : > { %1509 = vpow2.f32 %v688_v60 }
 0x2ea   : > { %v1508_v61 = vpop.eup %1507 }
 0x2eb   : > { %v798_v62 = vpop.xlane.xlu0 %797  ;;  %v577_v63 = vsel %vm520_vm2, %v1508_v61, 0.0 }
 0x2ec   : > { %v799_v0 = vsub.f32 %v795_v46, %v798_v62  ;;  %578 = vadd.xlane.f32.xlu0 %v577_v63  ;;  %v1500_v46 = vld [vmem:[%s1837_s4 + $0x8] sm:$0xff]   ;;  %v1338_v62 = vld [vmem:[%s1838_s5] ss:$0 sm:$0xff] }
 0x2ed   : > { %1447 = vmatpush3.bf16.msra.mxu1 %v1500_v46 }
 0x2ee   : > { %v800_v2 = vmul.f32 1.442695, %v799_v0  ;;  %1460 = vmatprep.subr.bf16.mxu1 %v1550_v1 }
 0x2f0   : > { %1511 = vpow2.f32 %v800_v2 }
 0x2f2   : > { %v1510_v4 = vpop.eup %1509 }
 0x2f3   : > { %v690_v5 = vsel %vm520_vm2, %v1510_v4, 0.0  ;;  %v910_v8 = vpop.xlane.xlu1 %909 }
 0x2f4   : > { %691 = vadd.xlane.f32.xlu1 %v690_v5  ;;  %v911_v9 = vsub.f32 %v907_v53, %v910_v8 }
 0x2f6   : > { %v912_v11 = vmul.f32 1.442695, %v911_v9 }
 0x2f8   : > { %1513 = vpow2.f32 %v912_v11 }
 0x2fa   : > { %v1512_v6 = vpop.eup %1511 }
 0x2fb   : > { %v802_v7 = vsel %vm520_vm2, %v1512_v6, 0.0 }
 0x2fc   : > { %803 = vadd.xlane.f32.xlu0 %v802_v7 }
 0x302   : > { %v1514_v12 = vpop.eup %1513 }
 0x303   : > { %v914_v13 = vsel %vm520_vm2, %v1514_v12, 0.0 }
 0x305   : > { %696 = vrot.lane.b32.xlu1 %v1688_v10, %s1559_s0 }
 0x312   : > { %583 = vrot.lane.b32.xlu0 %v1688_v10, %s1560_s25 }
 0x316   : > { %920 = vrot.lane.b32.xlu0 %v1688_v10, %s1561_s26 }
 0x329   : > { %915 = vadd.xlane.f32.xlu1 %v914_v13 }
 0x33a   : > { %808 = vrot.lane.b32.xlu1 %v1688_v10, %s1562_s27 }
 0x379   : > { %v579_v14 = vpop.xlane.xlu0 %578 }
 0x37a   : > { %1515 = vrcp.f32 %v579_v14  ;;  %v1501_v14 = vld [vmem:[%s1841_s8] sm:$0xff]  }
 0x381   : > { %v692_v15 = vpop.xlane.xlu1 %691 }
 0x382   : > { %1517 = vrcp.f32 %v692_v15  ;;  %v1503_v15 = vld [vmem:[%s1843_s10] sm:$0xff]  }
 0x384   : > { %v1516_v16 = vpop.eup %1515 }
 0x385   : > { %v581_v18 = vmul.f32 %v1516_v16, %v1508_v61  ;;  %v697_v21 = vpop.permute.xlu1 %696  ;;  %v1504_v16 = vld [vmem:[%s1843_s10 + $0x8] sm:$0xff]  }
 0x386   : > { %v702_v24 = vsel %vm588_vm4, %v697_v21, 0  ;;  %v1342_v21 = vld [vmem:[%s1839_s6] ss:$0 sm:$0xff] }
 0x387   : > { %v582_v22 = vpack.c.bf16 %v581_v18, %v581_v18 }
 0x389   : > { %v804_v17 = vpop.xlane.xlu0 %803 }
 0x38a   : > { %1519 = vrcp.f32 %v804_v17 }
 0x38c   : > { %v1518_v23 = vpop.eup %1517 }
 0x38d   : > { %v584_v19 = vpop.permute.xlu0 %583  ;;  %v694_v10 = vmul.f32 %v1518_v23, %v1510_v4  ;;  %v1343_v23 = vld [vmem:[%s1840_s7] ss:$0 sm:$0xff] }
 0x38e   : > { %v590_v20 = vsel %vm588_vm4, %v584_v19, 0 }
 0x38f   : > { %1403 = vmatpush3.bf16.msra.mxu0 %v590_v20  ;;  %v695_v25 = vpack.c.bf16 %v694_v10, %v694_v10 }
 0x390   : > { %1414 = vmatprep.subr.bf16.mxu0 %v1550_v1 }
 0x391   : > { %v921_v31 = vpop.permute.xlu0 %920 }
 0x392   : > { %1405 = vmatmul.mubr.msk.bf16.vlgmr.msra.gmra.mrb[4].mxu0 %vm520_vm2, %v582_v22  ;;  %v926_v33 = vsel %vm588_vm4, %v921_v31, 0 }
 0x393   : > { %1415 = vmatpush3.bf16.msra.mxu0 %v702_v24  ;;  %1416 = vmatprep.mubr.msk.bf16.mxu0 %vm1551_vm0, %v1550_v1 }
 0x394   : > { %1426 = vmatprep.subr.bf16.mxu0 %v1550_v1  ;;  %v1520_v26 = vpop.eup %1519 }
 0x395   : > { %v806_v28 = vmul.f32 %v1520_v26, %v1512_v6  ;;  %v1505_v26 = vld [vmem:[%s1843_s10 + $0x10] sm:$0xff]  }
 0x397   : > { %v807_v32 = vpack.c.bf16 %v806_v28, %v806_v28  ;;  %v1344_v28 = vld [vmem:[%s1842_s9] ss:$0 sm:$0xff] }
 0x39a   : > { %1417 = vmatmul.mubr.msk.bf16.vlgmr.msra.gmra.mrb[8].mxu0 %vm520_vm2, %v695_v25 }
 0x39b   : > { %1428 = vmatprep.mubr.msk.bf16.mxu0 %vm1551_vm0, %v1550_v1 }
 0x3b6   : > { %v916_v27 = vpop.xlane.xlu1 %915 }
 0x3b7   : > { %1521 = vrcp.f32 %v916_v27  ;;  %v1506_v27 = vld [vmem:[%s1843_s10 + $0x18] sm:$0xff]  }
 0x3ba   : > { %v809_v29 = vpop.permute.xlu1 %808 }
 0x3bb   : > { %v814_v30 = vsel %vm588_vm4, %v809_v29, 0 }
 0x3bc   : > { %1427 = vmatpush3.bf16.msra.mxu0 %v814_v30 }
 0x3bd   : > { %1438 = vmatprep.subr.bf16.mxu0 %v1550_v1 }
 0x3bf   : > { %1429 = vmatmul.mubr.msk.bf16.vlgmr.msra.gmra.mrb[12].mxu0 %vm520_vm2, %v807_v32 }
 0x3c0   : > { %1439 = vmatpush3.bf16.msra.mxu0 %v926_v33  ;;  %1440 = vmatprep.mubr.msk.bf16.mxu0 %vm1551_vm0, %v1550_v1 }
 0x3c1   : > { %v1522_v34 = vpop.eup %1521  ;;  %1452 = vmatprep.subr.bf16.mxu0 %v1550_v1 }
 0x3c2   : > { %v918_v35 = vmul.f32 %v1522_v34, %v1514_v12 }
 0x3c4   : > { %v919_v36 = vpack.c.bf16 %v918_v35, %v918_v35 }
 0x3c7   : > { %1441 = vmatmul.mubr.msk.bf16.vlgmr.msra.gmra.mrb[16].mxu0 %vm520_vm2, %v919_v36 }
 0x3c8   : > { %1456 = vmatprep.mubr.msk.bf16.mxu0 %vm1551_vm0, %v1550_v1  ;;  %1453 = vmatpush3.bf16.msra.mxu0 %v1501_v14 }
 0x3c9   : > { %1454 = vmatprep.subr.bf16.mxu0 %v1550_v1 }
 0x465   : > { %v626_v37 = vpop.f32.mrb[4].mxu0 }
 0x466   : > { %v1406_v38 = vpop.f32.mrb[5].mxu0 }
 0x467   : > { %v629_v39 = vpop.f32.mrb[6].mxu0 }
 0x468   : > { %v1407_v40 = vpop.f32.mrb[7].mxu0 }
 0x46d   : > { %v738_v41 = vpop.f32.mrb[8].mxu0 }
 0x46e   : > { %969 = vrot.lane.b32.xlu1 %v738_v41, %s1563_s28  ;;  %v1418_v42 = vpop.f32.mrb[9].mxu0 }
 0x46f   : > { %v741_v43 = vpop.f32.mrb[10].mxu0 }
 0x470   : > { %v1419_v44 = vpop.f32.mrb[11].mxu0 }
 0x492   : > { %v850_v47 = vpop.f32.mrb[12].mxu0 }
 0x493   : > { %973 = vrot.lane.b32.xlu0 %v850_v47, %s1564_s17  ;;  %v1430_v48 = vpop.f32.mrb[13].mxu0 }
 0x494   : > { %v853_v49 = vpop.f32.mrb[14].mxu0 }
 0x495   : > { %v1431_v50 = vpop.f32.mrb[15].mxu0 }
 0x49a   : > { %v962_v51 = vpop.f32.mrb[16].mxu0 }
 0x49b   : > { %977 = vrot.lane.b32.xlu1 %v962_v51, %s1565_s19  ;;  %v1442_v52 = vpop.f32.mrb[17].mxu0 }
 0x49c   : > { %v965_v53 = vpop.f32.mrb[18].mxu0  ;;  %v1354_v52 = vld [vmem:[%s1845_s12] ss:$0 sm:$0xff] }
 0x49d   : > { %v1443_v54 = vpop.f32.mrb[19].mxu0 }
 0x49e   : > { %v1355_v54 = vld [vmem:[%s1846_s13] ss:$0 sm:$0xff] }
 0x4e0   : > { %v970_v55 = vpop.permute.xlu1 %969 }
 0x4e1   : > { %v980_v57 = vsel %vm520_vm2, %v626_v37, %v970_v55 }
 0x505   : > { %v974_v56 = vpop.permute.xlu0 %973 }
 0x506   : > { %v982_v58 = vsel %vm981_vm5, %v980_v57, %v974_v56 }
 0x50d   : > { %v978_v59 = vpop.permute.xlu1 %977 }
 0x50e   : > { %v984_v60 = vsel %vm983_vm6, %v982_v58, %v978_v59 }
 0x50f   : > { %v985_v61 = vpack.c.bf16 %v984_v60, %v984_v60 }
 0x511   : > { %1449 = vmatmul.mubr.msk.bf16.vlgmr.msra.gmra.mrb[16].mxu1 %vm470_vm1, %v985_v61 }
 0x512   : > { %1468 = vmatprep.mubr.msk.bf16.mxu1 %vm1551_vm0, %v1550_v1  ;;  %1461 = vmatpush3.bf16.msra.mxu1 %v1503_v15 }
 0x513   : > { %1462 = vmatprep.subr.bf16.mxu1 %v1550_v1 }
 0x516   : > { %1463 = vmatpush3.bf16.msra.mxu1 %v1504_v16 }
 0x517   : > { %1464 = vmatprep.subr.bf16.mxu1 %v1550_v1 }
 0x51a   : > { %1465 = vmatpush3.bf16.msra.mxu1 %v1505_v26 }
 0x51b   : > { %1466 = vmatprep.subr.bf16.mxu1 %v1550_v1  ;;  %v1348_v1 = vld [vmem:[%s1844_s11] ss:$0 sm:$0xff] }
 0x51e   : > { %1467 = vmatpush3.bf16.msra.mxu1 %v1506_v27 }
 0x5e4   : > { %v1046_v63 = vpop.f32.mrb[16].mxu1 }
 0x5e5   : > { %v1047_v0 = vadd.f32 %v1338_v62, %v1046_v63  ;;  %v1450_v2 = vpop.f32.mrb[17].mxu1 }
 0x5e6   : > { %v1049_v4 = vpop.f32.mrb[18].mxu1 }
 0x5e7   : > { %v1451_v5 = vpop.f32.mrb[19].mxu1  ;;  %v1052_v6 = vadd.f32 %v1047_v0, %v1678_v3  ;;  %v1502_v3 = vld [vmem:[%s1841_s8 + $0x8] sm:$0xff]  }
 0x5e8   : > { %1455 = vmatpush3.bf16.msra.mxu0 %v1502_v3 }
 0x5e9   : > { %v1055_v7 = vsel %vm470_vm1, %v1052_v6, 0.0 }
 0x5ea   : > { %1056 = vadd.xlane.f32.xlu0 %v1055_v7 }
 0x677   : > { %v1057_v8 = vpop.xlane.xlu0 %1056 }
 0x678   : > { %v1059_v9 = vmul.f32 0.03125, %v1057_v8 }
 0x67a   : > { %v1060_v11 = vsub.f32 %v1052_v6, %v1059_v9 }
 0x67c   : > { %v1061_v12 = vmul.f32 %v1060_v11, %v1060_v11 }
 0x67e   : > { %v1062_v13 = vsel %vm470_vm1, %v1061_v12, 0.0 }
 0x67f   : > { %1063 = vadd.xlane.f32.xlu1 %v1062_v13 }
 0x70c   : > { %v1064_v17 = vpop.xlane.xlu1 %1063 }
 0x70d   : > { %v1065_v18 = vmul.f32 0.03125, %v1064_v17 }
 0x70f   : > { %v1066_v19 = vadd.f32 1e-05, %v1065_v18 }
 0x711   : > { %1523 = vrsqrt.f32 %v1066_v19 }
 0x71b   : > { %v1524_v20 = vpop.eup %1523 }
 0x71c   : > { %v1068_v22 = vmul.f32 %v1524_v20, %v1060_v11 }
 0x71e   : > { %v1075_v24 = vmul.f32 %v1342_v21, %v1068_v22 }
 0x720   : > { %v1082_v10 = vadd.f32 %v1343_v23, %v1075_v24 }
 0x722   : > { %v1083_v25 = vpack.c.bf16 %v1082_v10, %v1082_v10 }
 0x724   : > { %1457 = vmatmul.mubr.msk.bf16.vlgmr.msra.gmra.mrb[20].mxu0 %vm470_vm1, %v1083_v25 }
 0x7f7   : > { %v1144_v29 = vpop.f32.mrb[20].mxu0 }
 0x7f8   : > { %v1145_v30 = vadd.f32 %v1344_v28, %v1144_v29  ;;  %v1458_v31 = vpop.f32.mrb[21].mxu0 }
 0x7f9   : > { %v1147_v32 = vpop.f32.mrb[22].mxu0 }
 0x7fa   : > { %v1150_v33 = vmax.f32 %v1145_v30, 0.0  ;;  %v1459_v34 = vpop.f32.mrb[23].mxu0 }
 0x7fc   : > { %v1151_v35 = vpack.c.bf16 %v1150_v33, %v1150_v33 }
 0x7fe   : > { %1469 = vmatmul.mubr.msk.bf16.vlgmr.msra.gmra.mrb[20].mxu1 %vm1191_vm7, %v1151_v35 }
 0x8d1   : > { %v1229_v36 = vpop.f32.mrb[20].mxu1 }
 0x8d2   : > { %v1230_v37 = vadd.f32 %v1348_v1, %v1229_v36  ;;  %v1470_v38 = vpop.f32.mrb[21].mxu1 }
 0x8d3   : > { %v1232_v39 = vpop.f32.mrb[22].mxu1 }
 0x8d4   : > { %v1471_v40 = vpop.f32.mrb[23].mxu1  ;;  %v1235_v41 = vadd.f32 %v1230_v37, %v1082_v10 }
 0x8d6   : > { %v1238_v42 = vsel %vm470_vm1, %v1235_v41, 0.0 }
 0x8d7   : > { %1239 = vadd.xlane.f32.xlu0 %v1238_v42 }
 0x964   : > { %v1240_v43 = vpop.xlane.xlu0 %1239 }
 0x965   : > { %v1241_v44 = vmul.f32 0.03125, %v1240_v43 }
 0x967   : > { %v1242_v45 = vsub.f32 %v1235_v41, %v1241_v44 }
 0x969   : > { %v1243_v46 = vmul.f32 %v1242_v45, %v1242_v45 }
 0x96b   : > { %v1244_v47 = vsel %vm470_vm1, %v1243_v46, 0.0 }
 0x96c   : > { %1245 = vadd.xlane.f32.xlu0 %v1244_v47 }
 0x9f9   : > { %v1246_v48 = vpop.xlane.xlu0 %1245 }
 0x9fa   : > { %v1247_v49 = vmul.f32 0.03125, %v1246_v48 }
 0x9fc   : > { %v1248_v50 = vadd.f32 1e-05, %v1247_v49 }
 0x9fe   : > { %1525 = vrsqrt.f32 %v1248_v50 }
 0xa08   : > { %v1526_v51 = vpop.eup %1525 }
 0xa09   : > { %v1250_v53 = vmul.f32 %v1526_v51, %v1242_v45 }
 0xa0b   : > { %v1257_v55 = vmul.f32 %v1354_v52, %v1250_v53 }
 0xa0d   : > { %v1264_v56 = vadd.f32 %v1355_v54, %v1257_v55 }
 0xa0f   : > { %1265 = vst.msk [vmem:[%s442_s20] sm:$0xff] %vm470_vm1, %v1264_v56 }
 0xa10 PF: > { %s30_s18 = sadd.s32 1, %s1547_s18  }
 0xa11   : > { %p27_p9 = scmp.ge.s32.totalorder %s30_s18, 4  }
 0xa13   :  { %29 = sbr.rel (!%p27_p9) target bundleno = 16 (0x10), region = 102 }

</bundles_post_ra>
